<compile_context>
chip_gen: v7x
topology: tpu7x:2x2x1
jax: 0.10.0
libtpu: 0.0.40
codegen_flags: <defaults>
</compile_context>

<pallas_src>
import jax
import jax.numpy as jnp
from jax.experimental import pallas as pl
from jax.experimental.pallas import tpu as pltpu


def _round_up(x, m):
    return ((x + m - 1) // m) * m


def _mlp_kernel(x_ref, w1_ref, b1_ref, w2_ref, b2_ref, w3_ref, b3_ref, o_ref):
    # Layer 1: Linear + ReLU (bf16 MXU operands, f32 accumulation, f32 epilogue).
    x = x_ref[...].astype(jnp.bfloat16)
    h = jnp.dot(x, w1_ref[...], preferred_element_type=jnp.float32)
    h = jnp.maximum(h + b1_ref[...], 0.0)
    # Layer 2: Linear + ReLU.
    h = jnp.dot(h.astype(jnp.bfloat16), w2_ref[...], preferred_element_type=jnp.float32)
    h = jnp.maximum(h + b2_ref[...], 0.0)
    # Layer 3: Linear (no activation).
    out = jnp.dot(h.astype(jnp.bfloat16), w3_ref[...], preferred_element_type=jnp.float32)
    o_ref[...] = (out + b3_ref[...]).astype(o_ref.dtype)


def dcca_projection_head(x, params, *, tile_b=512):
    """Fused 3-layer MLP. x: (B, input_dim). Returns (B, output_dim)."""
    (w1, b1), (w2, b2), (w3, b3) = params
    B, d_in = x.shape
    d_h1 = w1.shape[1]
    d_h2 = w2.shape[1]
    d_out = w3.shape[1]

    # MXU operands in bf16 (accumulation stays f32 inside the kernel); biases f32.
    w1b = w1.astype(jnp.bfloat16)
    w2b = w2.astype(jnp.bfloat16)
    w3b = w3.astype(jnp.bfloat16)
    b1f = b1.astype(jnp.float32)
    b2f = b2.astype(jnp.float32)
    b3f = b3.astype(jnp.float32)

    # Tile selection:
    #  - multiples of 128 rows keep the systolic array full on v5e/v6e/v7x,
    #  - never drop below 128 rows for small batches (pad instead),
    #  - cap at ceil(B/2) rounded to 128 so large batches give >= 2 grid steps
    #    (keeps both v7x TensorCores fed; harmless on single-core v5e/v6e).
    tile_b = min(int(tile_b), max(128, _round_up(pl.cdiv(B, 2), 128)))
    tile_b = _round_up(tile_b, 128)

    padded_B = _round_up(B, tile_b)
    x_p = x if padded_B == B else jnp.pad(x, ((0, padded_B - B), (0, 0)))
    grid = (padded_B // tile_b,)

    # Explicit VMEM budget: double-buffered x/out tiles + resident (double-buffered)
    # bf16 weights + f32/bf16 intermediates, with headroom; capped for v7x (64 MiB).
    out_itemsize = jnp.dtype(x.dtype).itemsize
    weight_bytes = 2 * (d_in * d_h1 + d_h1 * d_h2 + d_h2 * d_out)           # bf16
    bias_bytes = 4 * (d_h1 + d_h2 + d_out)
    io_bytes = 2 * tile_b * d_in * x_p.dtype.itemsize + 2 * tile_b * d_out * out_itemsize
    interm_bytes = tile_b * (d_h1 + d_h2) * 4 + tile_b * (d_in + d_h1 + d_h2) * 2
    vmem_limit = int(1.5 * (2 * weight_bytes + 2 * bias_bytes + io_bytes + interm_bytes)) + (4 << 20)
    vmem_limit = min(vmem_limit, 48 * 1024 * 1024)

    flops = 2 * B * (d_in * d_h1 + d_h1 * d_h2 + d_h2 * d_out)
    bytes_accessed = (B * d_in * x.dtype.itemsize
                      + weight_bytes + bias_bytes
                      + B * d_out * out_itemsize)
    cost = pl.CostEstimate(flops=flops, transcendentals=0, bytes_accessed=bytes_accessed)

    full = lambda i: (0, 0)  # grid-invariant: weights/biases stay resident in VMEM
    out = pl.pallas_call(
        _mlp_kernel,
        out_shape=jax.ShapeDtypeStruct((padded_B, d_out), x.dtype),
        grid_spec=pltpu.PrefetchScalarGridSpec(
            num_scalar_prefetch=0,
            grid=grid,
            in_specs=[
                pl.BlockSpec((tile_b, d_in), lambda i: (i, 0)),
                pl.BlockSpec((d_in, d_h1), full),
                pl.BlockSpec((1, d_h1), full),
                pl.BlockSpec((d_h1, d_h2), full),
                pl.BlockSpec((1, d_h2), full),
                pl.BlockSpec((d_h2, d_out), full),
                pl.BlockSpec((1, d_out), full),
            ],
            out_specs=pl.BlockSpec((tile_b, d_out), lambda i: (i, 0)),
        ),
        compiler_params=pltpu.CompilerParams(
            dimension_semantics=("parallel",),
            vmem_limit_bytes=vmem_limit,
        ),
        cost_estimate=cost,
    )(x_p, w1b, b1f, w2b, b2f, w3b, b3f)

    return out[:B] if padded_B != B else out


def init_params(key, input_dim=512, output_dim=128, hidden_dims=(512, 256),
                dtype=jnp.float32):
    """Deterministic init mimicking torch.nn.Linear default (uniform +/- 1/sqrt(fan_in)).
    Weights are stored transposed: shape (in_features, out_features)."""
    dims = [input_dim] + list(hidden_dims) + [output_dim]
    params = []
    for i in range(len(dims) - 1):
        fan_in, fan_out = dims[i], dims[i + 1]
        key, kw, kb = jax.random.split(key, 3)
        bound = 1.0 / (fan_in ** 0.5)
        w = jax.random.uniform(kw, (fan_in, fan_out), dtype, -bound, bound)
        b = jax.random.uniform(kb, (1, fan_out), dtype, -bound, bound)
        params.append((w, b))
    return params


def reference_forward(x, params):
    """Pure-JAX f32 reference (same math as the PyTorch module)."""
    (w1, b1), (w2, b2), (w3, b3) = params
    h = jnp.maximum(x @ w1 + b1, 0.0)
    h = jnp.maximum(h @ w2 + b2, 0.0)
    return h @ w3 + b3


if __name__ == "__main__":
    # Module default dims: input_dim=512, hidden_dims=[512, 256], output_dim=128.
    # Small (non-tile-multiple) batch exercises the cdiv + padding path.
    B, INPUT_DIM, OUTPUT_DIM = 8, 512, 128
    HIDDEN_DIMS = (512, 256)

    key = jax.random.PRNGKey(0)
    key, kx = jax.random.split(key)
    x = jax.random.normal(kx, (B, INPUT_DIM), jnp.float32)

    params = init_params(key, INPUT_DIM, OUTPUT_DIM, HIDDEN_DIMS)

    y = dcca_projection_head(x, params)
    y = jax.block_until_ready(y)

    y_ref = reference_forward(x, params)
    assert y.shape == (B, OUTPUT_DIM)
    # bf16 MXU operands (f32 accumulation) change low-order bits vs the f32
    # reference, so the tolerance is loosened accordingly.
    assert jnp.allclose(y, y_ref, atol=3e-2, rtol=3e-2), "mismatch vs reference"

    print("KERNEL_OK")
</pallas_src>

<mosaic_0001>
module attributes {stable_mosaic.version = 11 : i64} {
  func.func @_mlp_kernel(%arg0: i32, %arg1: memref<128x512xf32, #tpu.memory_space<vmem>>, %arg2: memref<512x512xbf16, #tpu.memory_space<vmem>>, %arg3: memref<1x512xf32, #tpu.memory_space<vmem>>, %arg4: memref<512x256xbf16, #tpu.memory_space<vmem>>, %arg5: memref<1x256xf32, #tpu.memory_space<vmem>>, %arg6: memref<256x128xbf16, #tpu.memory_space<vmem>>, %arg7: memref<1x128xf32, #tpu.memory_space<vmem>>, %arg8: memref<128x128xf32, #tpu.memory_space<vmem>>) attributes {dimension_semantics = [#tpu.dimension_semantics<parallel>], iteration_bounds = array<i64: 1>, scalar_prefetch = 0 : i64, scratch_operands = 0 : i64, tpu.core_type = #tpu.core_type<tc>, window_params = [{transform_indices = @transform_0, window_bounds = array<i64: 128, 512>}, {pipeline_mode = #tpu.pipeline_mode<synchronous>, transform_indices = @transform_1, window_bounds = array<i64: 512, 512>}, {pipeline_mode = #tpu.pipeline_mode<synchronous>, transform_indices = @transform_2, window_bounds = array<i64: 1, 512>}, {pipeline_mode = #tpu.pipeline_mode<synchronous>, transform_indices = @transform_3, window_bounds = array<i64: 512, 256>}, {pipeline_mode = #tpu.pipeline_mode<synchronous>, transform_indices = @transform_4, window_bounds = array<i64: 1, 256>}, {pipeline_mode = #tpu.pipeline_mode<synchronous>, transform_indices = @transform_5, window_bounds = array<i64: 256, 128>}, {pipeline_mode = #tpu.pipeline_mode<synchronous>, transform_indices = @transform_6, window_bounds = array<i64: 1, 128>}, {transform_indices = @transform_7, window_bounds = array<i64: 128, 128>}]} {
    %c0 = arith.constant 0 : index
    %c0_0 = arith.constant 0 : index
    %0 = vector.load %arg1[%c0, %c0_0] : memref<128x512xf32, #tpu.memory_space<vmem>>, vector<128x512xf32>
    %1 = arith.truncf %0 : vector<128x512xf32> to vector<128x512xbf16>
    %c0_1 = arith.constant 0 : index
    %c0_2 = arith.constant 0 : index
    %2 = vector.load %arg2[%c0_1, %c0_2] : memref<512x512xbf16, #tpu.memory_space<vmem>>, vector<512x512xbf16>
    %cst = arith.constant dense<0.000000e+00> : vector<128x512xf32>
    %3 = tpu.matmul %1, %2, %cst {dimension_numbers = #tpu.dot_dimension_numbers<[1], [0], [0], [1], [0, 0, 1, 1], [], []>} : vector<128x512xbf16>, vector<512x512xbf16>, vector<128x512xf32> -> vector<128x512xf32>
    %c0_3 = arith.constant 0 : index
    %c0_4 = arith.constant 0 : index
    %4 = vector.load %arg3[%c0_3, %c0_4] : memref<1x512xf32, #tpu.memory_space<vmem>>, vector<1x512xf32>
    %5 = vector.broadcast %4 : vector<1x512xf32> to vector<128x512xf32>
    %6 = arith.addf %3, %5 : vector<128x512xf32>
    %cst_5 = arith.constant 0.000000e+00 : f32
    %7 = vector.broadcast %cst_5 : f32 to vector<128x512xf32>
    %8 = arith.maximumf %6, %7 : vector<128x512xf32>
    %9 = arith.truncf %8 : vector<128x512xf32> to vector<128x512xbf16>
    %c0_6 = arith.constant 0 : index
    %c0_7 = arith.constant 0 : index
    %10 = vector.load %arg4[%c0_6, %c0_7] : memref<512x256xbf16, #tpu.memory_space<vmem>>, vector<512x256xbf16>
    %cst_8 = arith.constant dense<0.000000e+00> : vector<128x256xf32>
    %11 = tpu.matmul %9, %10, %cst_8 {dimension_numbers = #tpu.dot_dimension_numbers<[1], [0], [0], [1], [0, 0, 1, 1], [], []>} : vector<128x512xbf16>, vector<512x256xbf16>, vector<128x256xf32> -> vector<128x256xf32>
    %c0_9 = arith.constant 0 : index
    %c0_10 = arith.constant 0 : index
    %12 = vector.load %arg5[%c0_9, %c0_10] : memref<1x256xf32, #tpu.memory_space<vmem>>, vector<1x256xf32>
    %13 = vector.broadcast %12 : vector<1x256xf32> to vector<128x256xf32>
    %14 = arith.addf %11, %13 : vector<128x256xf32>
    %cst_11 = arith.constant 0.000000e+00 : f32
    %15 = vector.broadcast %cst_11 : f32 to vector<128x256xf32>
    %16 = arith.maximumf %14, %15 : vector<128x256xf32>
    %17 = arith.truncf %16 : vector<128x256xf32> to vector<128x256xbf16>
    %c0_12 = arith.constant 0 : index
    %c0_13 = arith.constant 0 : index
    %18 = vector.load %arg6[%c0_12, %c0_13] : memref<256x128xbf16, #tpu.memory_space<vmem>>, vector<256x128xbf16>
    %cst_14 = arith.constant dense<0.000000e+00> : vector<128x128xf32>
    %19 = tpu.matmul %17, %18, %cst_14 {dimension_numbers = #tpu.dot_dimension_numbers<[1], [0], [0], [1], [0, 0, 1, 1], [], []>} : vector<128x256xbf16>, vector<256x128xbf16>, vector<128x128xf32> -> vector<128x128xf32>
    %c0_15 = arith.constant 0 : index
    %c0_16 = arith.constant 0 : index
    %20 = vector.load %arg7[%c0_15, %c0_16] : memref<1x128xf32, #tpu.memory_space<vmem>>, vector<1x128xf32>
    %21 = vector.broadcast %20 : vector<1x128xf32> to vector<128x128xf32>
    %22 = arith.addf %19, %21 : vector<128x128xf32>
    %c0_17 = arith.constant 0 : index
    %c0_18 = arith.constant 0 : index
    %23 = vector.load %arg8[%c0_17, %c0_18] : memref<128x128xf32, #tpu.memory_space<vmem>>, vector<128x128xf32>
    tpu.vector_store %arg8[%c0_17, %c0_18], %22 {strides = array<i32>} : memref<128x128xf32, #tpu.memory_space<vmem>>, vector<128x128xf32>,
    return
  }
  func.func @transform_0(%arg0: i32) -> (i32, i32) {
    %c0_i32 = arith.constant 0 : i32
    %c0_i32_0 = arith.constant 0 : i32
    return %arg0, %c0_i32 : i32, i32
  }
  func.func @transform_1(%arg0: i32) -> (i32, i32) {
    %c0_i32 = arith.constant 0 : i32
    %c0_i32_0 = arith.constant 0 : i32
    %c0_i32_1 = arith.constant 0 : i32
    return %c0_i32, %c0_i32_0 : i32, i32
  }
  func.func @transform_2(%arg0: i32) -> (i32, i32) {
    %c0_i32 = arith.constant 0 : i32
    %c0_i32_0 = arith.constant 0 : i32
    %c0_i32_1 = arith.constant 0 : i32
    return %c0_i32, %c0_i32_0 : i32, i32
  }
  func.func @transform_3(%arg0: i32) -> (i32, i32) {
    %c0_i32 = arith.constant 0 : i32
    %c0_i32_0 = arith.constant 0 : i32
    %c0_i32_1 = arith.constant 0 : i32
    return %c0_i32, %c0_i32_0 : i32, i32
  }
  func.func @transform_4(%arg0: i32) -> (i32, i32) {
    %c0_i32 = arith.constant 0 : i32
    %c0_i32_0 = arith.constant 0 : i32
    %c0_i32_1 = arith.constant 0 : i32
    return %c0_i32, %c0_i32_0 : i32, i32
  }
  func.func @transform_5(%arg0: i32) -> (i32, i32) {
    %c0_i32 = arith.constant 0 : i32
    %c0_i32_0 = arith.constant 0 : i32
    %c0_i32_1 = arith.constant 0 : i32
    return %c0_i32, %c0_i32_0 : i32, i32
  }
  func.func @transform_6(%arg0: i32) -> (i32, i32) {
    %c0_i32 = arith.constant 0 : i32
    %c0_i32_0 = arith.constant 0 : i32
    %c0_i32_1 = arith.constant 0 : i32
    return %c0_i32, %c0_i32_0 : i32, i32
  }
  func.func @transform_7(%arg0: i32) -> (i32, i32) {
    %c0_i32 = arith.constant 0 : i32
    %c0_i32_0 = arith.constant 0 : i32
    return %arg0, %c0_i32 : i32, i32
  }
}

</mosaic_0001>

<bundles_post_ra>
// kernel: tpu_custom_call.1
= control target key start
LH: loop header
LB: loop body
LE: loop exit
PB: predicated region body
PF: predicated region fallthrough
CT: control target
= control target key end

     0   :  { %12 = vsyncpa [#allocation3], 0  ;;  %s3830_s0 = inlined_call_operand.hbm [shape: f32[128,512], index: 0, kind: input, shape index: {}]   ;;  %s3831_s1 = inlined_call_operand.hbm [shape: bf16[512,512], index: 1, kind: input, shape index: {}]   ;;  %s3832_s2 = inlined_call_operand.vmem [shape: f32[1,512], index: 2, kind: input, shape index: {}]   ;;  %s3833_s3 = inlined_call_operand.hbm [shape: bf16[512,256], index: 3, kind: input, shape index: {}]   ;;  %s3834_s4 = inlined_call_operand.vmem [shape: f32[1,256], index: 4, kind: input, shape index: {}]   ;;  %s3835_s5 = inlined_call_operand.hbm [shape: bf16[256,128], index: 5, kind: input, shape index: {}]   ;;  %s3836_s6 = inlined_call_operand.vmem [shape: f32[1,128], index: 6, kind: input, shape index: {}]   ;;  %s3837_s7 = inlined_call_operand.hbm [shape: f32[128,128], index: 7, kind: output, shape index: {}]  }
   0x1   :  { %13 = vsyncpa [#allocation6], 0 }
   0x2   :  { %14 = vsyncpa [#allocation9], 0 }
   0x3   :  { %15 = vsyncpa [#allocation4], 0  ;;  %s3386_s24 = smov [#allocation5]   ;;  %s3268_s28 = scalar_lea.hbm %s3831_s1, 16384 }
   0x4   :  { %s33_s25 = sshll.u32 %s3386_s24, 4  ;;  %p3269_p0 = scmp.ne.s32.totalorder %s3831_s1, %s3268_s28  ;;  %s34_s25 = int_to_ptr.vmem [resolvable:$true] %s33_s25 }
   0x5   :  { %p3272_p1 = scmp.lt.u32.totalorder %s3268_s28, %s3831_s1 }
   0x7   :  { %p3274_p2 = pnand %p3272_p1, %p3269_p0 }
   0x9   :  { %3277 = shalt.err (!%p3274_p2)
}
   0xa   :  { %s3278_s10 = scalar_lea.vmem %s34_s25, 16384  ;;  %p3283_p4 = scmp.lt.s32.totalorder %s34_s25, %s34_s25 }
   0xb   :  { %p3279_p3 = scmp.ne.s32.totalorder %s34_s25, %s3278_s10  ;;  %p3284_p5 = scmp.lt.s32.totalorder %s3278_s10, %s3278_s10 }
   0xd   :  { %p3285_p6 = por %p3284_p5, %p3283_p4 }
   0xf   :  { %p3286_p7 = pnand %p3285_p6, %p3279_p3 }
  0x11   :  { %3289 = shalt.err (!%p3286_p7)
}
  0x12   :  { %s3387_s11 = smov 256   ;;  %s3388_s12 = smov 16  }
  0x13   :  { %39 = dma.hbm_to_vmem [thread:$0]  %s3831_s1, 16384, %s34_s25, [#allocation6], %s3387_s11, %s3387_s11, %s3388_s12  }
  0x14   :  { %s3389_s15 = smov [#allocation2]   ;;  %s3290_s19 = scalar_lea.hbm %s3830_s0, 8192 }
  0x15   :  { %s21_s16 = sshll.u32 %s3389_s15, 4  ;;  %p3291_p8 = scmp.ne.s32.totalorder %s3830_s0, %s3290_s19  ;;  %s22_s16 = int_to_ptr.vmem [resolvable:$true] %s21_s16 }
  0x16   :  { %p3294_p9 = scmp.lt.u32.totalorder %s3290_s19, %s3830_s0 }
  0x18   :  { %p3296_p10 = pnand %p3294_p9, %p3291_p8 }
  0x1a   :  { %3299 = shalt.err (!%p3296_p10)
}
  0x1b   :  { %s3300_s24 = scalar_lea.vmem %s22_s16, 8192  ;;  %p3305_p12 = scmp.lt.s32.totalorder %s22_s16, %s22_s16 }
  0x1c   :  { %p3301_p11 = scmp.ne.s32.totalorder %s22_s16, %s3300_s24  ;;  %p3306_p13 = scmp.lt.s32.totalorder %s3300_s24, %s3300_s24 }
  0x1e   :  { %p3307_p0 = por %p3306_p13, %p3305_p12 }
  0x20   :  { %p3308_p1 = pnand %p3307_p0, %p3301_p11 }
  0x22   :  { %3311 = shalt.err (!%p3308_p1)
}
  0x23   :  { %s3390_s1 = smov 512   ;;  %s3391_s25 = smov 32  }
  0x24   :  { %27 = dma.hbm_to_vmem [thread:$0]  %s3830_s0, 8192, %s22_s16, [#allocation3], %s3390_s1, %s3390_s1, %s3391_s25  }
  0x25   :  { %s3392_s28 = smov [#allocation7]   ;;  %s3312_s9 = scalar_lea.hbm %s3833_s3, 8192 }
  0x26   :  { %s47_s29 = sshll.u32 %s3392_s28, 4  ;;  %p3313_p2 = scmp.ne.s32.totalorder %s3833_s3, %s3312_s9  ;;  %s48_s29 = int_to_ptr.vmem [resolvable:$true] %s47_s29 }
  0x27   :  { %p3316_p3 = scmp.lt.u32.totalorder %s3312_s9, %s3833_s3 }
  0x29   :  { %p3318_p4 = pnand %p3316_p3, %p3313_p2 }
  0x2b   :  { %3321 = shalt.err (!%p3318_p4)
}
  0x2c   :  { %s3322_s14 = scalar_lea.vmem %s48_s29, 8192  ;;  %p3327_p6 = scmp.lt.s32.totalorder %s48_s29, %s48_s29 }
  0x2d   :  { %p3323_p5 = scmp.ne.s32.totalorder %s48_s29, %s3322_s14  ;;  %p3328_p7 = scmp.lt.s32.totalorder %s3322_s14, %s3322_s14 }
  0x2f   :  { %p3329_p8 = por %p3328_p7, %p3327_p6 }
  0x31   :  { %p3330_p9 = pnand %p3329_p8, %p3323_p5 }
  0x33   :  { %3333 = shalt.err (!%p3330_p9)
}
  0x34   :  { %s3393_s0 = smov 128   ;;  %s3394_s15 = smov 8  }
  0x35   :  { %53 = dma.hbm_to_vmem [thread:$0]  %s3833_s3, 8192, %s48_s29, [#allocation6], %s3393_s0, %s3393_s0, %s3394_s15  }
  0x36   :  { %s3395_s18 = smov [#allocation8]   ;;  %s3334_s22 = scalar_lea.hbm %s3835_s5, 2048 }
  0x37   :  { %s61_s19 = sshll.u32 %s3395_s18, 4  ;;  %p3335_p10 = scmp.ne.s32.totalorder %s3835_s5, %s3334_s22  ;;  %s62_s19 = int_to_ptr.vmem [resolvable:$true] %s61_s19 }
  0x38   :  { %p3338_p11 = scmp.lt.u32.totalorder %s3334_s22, %s3835_s5 }
  0x3a   :  { %p3340_p12 = pnand %p3338_p11, %p3335_p10 }
  0x3c   :  { %3343 = shalt.err (!%p3340_p12)
}
  0x3d   :  { %s3344_s26 = scalar_lea.vmem %s62_s19, 2048  ;;  %p3349_p0 = scmp.lt.s32.totalorder %s62_s19, %s62_s19 }
  0x3e   :  { %p3345_p13 = scmp.ne.s32.totalorder %s62_s19, %s3344_s26  ;;  %p3350_p1 = scmp.lt.s32.totalorder %s3344_s26, %s3344_s26 }
  0x40   :  { %p3351_p2 = por %p3350_p1, %p3349_p0 }
  0x42   :  { %p3352_p3 = pnand %p3351_p2, %p3345_p13 }
  0x44   :  { %3355 = shalt.err (!%p3352_p3)
}
  0x45   :  { %s3396_s3 = smov 64   ;;  %s3397_s27 = smov 4  }
  0x46   :  { %67 = dma.hbm_to_vmem [thread:$0]  %s3835_s5, 2048, %s62_s19, [#allocation9], %s3396_s3, %s3396_s3, %s3397_s27  }
  0x47   :  { %3378 = dma.done.wait [#allocation3], 8192  }
  0x48   :  { %3379 = vsyncadd [#allocation3], 4294959104 }
  0x49   :  { %3380 = dma.done.wait [#allocation6], 24576  }
  0x4a   :  { %3381 = vsyncadd [#allocation6], 4294942720 }
  0x4b   :  { %3382 = dma.done.wait [#allocation9], 2048  }
  0x4c   :  { %3383 = vsyncadd [#allocation9], 4294965248  ;;  %v2964_v0 = vld [vmem:[#allocation5 + $0x4] ss:$16 sps:$4 sm:$0xff]   ;;  %v2966_v1 = vld [vmem:[#allocation5 + $0xc] ss:$16 sps:$4 sm:$0xff]  }
  0x4d   :  { %969 = vmatprep.subr.bf16.mxu0 %v2964_v0  ;;  %v2968_v2 = vld [vmem:[#allocation5] ss:$16 sps:$4 sm:$0xff]   ;;  %v2969_v3 = vld [vmem:[#allocation5 + $0x8] ss:$16 sps:$4 sm:$0xff]   ;;  %1195 = vmatprep.subr.bf16.mxu1 %v2966_v1  ;;  %v2970_v4 = vld [vmem:[#allocation5 + $0x24] ss:$16 sps:$4 sm:$0xff]  }
  0x4e   :  { %970 = vmatpush1.bf16.msra.mxu0 %v2968_v2  ;;  %1196 = vmatpush1.bf16.msra.mxu1 %v2969_v3  ;;  %v2972_v5 = vld [vmem:[#allocation5 + $0x2c] ss:$16 sps:$4 sm:$0xff]   ;;  %v2974_v6 = vld [vmem:[#allocation5 + $0x20] ss:$16 sps:$4 sm:$0xff]   ;;  %v2975_v7 = vld [vmem:[#allocation5 + $0x28] ss:$16 sps:$4 sm:$0xff]  }
  0x4f   :  { %971 = vmatprep.subr.bf16.mxu0 %v2970_v4  ;;  %1197 = vmatprep.subr.bf16.mxu1 %v2972_v5  ;;  %v2976_v8 = vld [vmem:[#allocation5 + $0x44] ss:$16 sps:$4 sm:$0xff]   ;;  %v2978_v9 = vld [vmem:[#allocation5 + $0x4c] ss:$16 sps:$4 sm:$0xff]   ;;  %v2980_v10 = vld [vmem:[#allocation5 + $0x40] ss:$16 sps:$4 sm:$0xff]  }
  0x50   :  { %v2981_v11 = vld [vmem:[#allocation5 + $0x48] ss:$16 sps:$4 sm:$0xff]   ;;  %v2982_v12 = vld [vmem:[#allocation5 + $0x64] ss:$16 sps:$4 sm:$0xff]   ;;  %v2984_v13 = vld [vmem:[#allocation5 + $0x6c] ss:$16 sps:$4 sm:$0xff]  }
  0x51   :  { %v2986_v14 = vld [vmem:[#allocation5 + $0x60] ss:$16 sps:$4 sm:$0xff]   ;;  %v2987_v15 = vld [vmem:[#allocation5 + $0x68] ss:$16 sps:$4 sm:$0xff]   ;;  %v2988_v16 = vld [vmem:[#allocation5 + $0x84] ss:$16 sps:$4 sm:$0xff]  }
  0x52   :  { %972 = vmatpush1.bf16.msra.mxu0 %v2974_v6  ;;  %1198 = vmatpush1.bf16.msra.mxu1 %v2975_v7  ;;  %v2990_v17 = vld [vmem:[#allocation5 + $0x8c] ss:$16 sps:$4 sm:$0xff]   ;;  %v2992_v18 = vld [vmem:[#allocation5 + $0x80] ss:$16 sps:$4 sm:$0xff]   ;;  %v2993_v19 = vld [vmem:[#allocation5 + $0x88] ss:$16 sps:$4 sm:$0xff]  }
  0x53   :  { %973 = vmatprep.subr.bf16.mxu0 %v2976_v8  ;;  %1199 = vmatprep.subr.bf16.mxu1 %v2978_v9  ;;  %v2994_v20 = vld [vmem:[#allocation5 + $0xa4] ss:$16 sps:$4 sm:$0xff]   ;;  %v2996_v21 = vld [vmem:[#allocation5 + $0xac] ss:$16 sps:$4 sm:$0xff]   ;;  %v2998_v22 = vld [vmem:[#allocation5 + $0xa0] ss:$16 sps:$4 sm:$0xff]  }
  0x54   :  { %v2999_v23 = vld [vmem:[#allocation5 + $0xa8] ss:$16 sps:$4 sm:$0xff]   ;;  %v3000_v24 = vld [vmem:[#allocation5 + $0xc4] ss:$16 sps:$4 sm:$0xff]   ;;  %v3002_v25 = vld [vmem:[#allocation5 + $0xcc] ss:$16 sps:$4 sm:$0xff]  }
  0x55   :  { %v3004_v26 = vld [vmem:[#allocation5 + $0xc0] ss:$16 sps:$4 sm:$0xff]   ;;  %v3005_v27 = vld [vmem:[#allocation5 + $0xc8] ss:$16 sps:$4 sm:$0xff]   ;;  %v3006_v28 = vld [vmem:[#allocation5 + $0xe4] ss:$16 sps:$4 sm:$0xff]  }
  0x56   :  { %974 = vmatpush1.bf16.msra.mxu0 %v2980_v10  ;;  %1200 = vmatpush1.bf16.msra.mxu1 %v2981_v11  ;;  %v3008_v29 = vld [vmem:[#allocation5 + $0xec] ss:$16 sps:$4 sm:$0xff]   ;;  %v3010_v30 = vld [vmem:[#allocation5 + $0xe0] ss:$16 sps:$4 sm:$0xff]   ;;  %v3011_v31 = vld [vmem:[#allocation5 + $0xe8] ss:$16 sps:$4 sm:$0xff]  }
  0x57   :  { %975 = vmatprep.subr.bf16.mxu0 %v2982_v12  ;;  %1201 = vmatprep.subr.bf16.mxu1 %v2984_v13  ;;  %v3012_v32 = vld [vmem:[#allocation5 + $0x104] ss:$16 sps:$4 sm:$0xff]   ;;  %v3014_v33 = vld [vmem:[#allocation5 + $0x10c] ss:$16 sps:$4 sm:$0xff]   ;;  %v3016_v34 = vld [vmem:[#allocation5 + $0x100] ss:$16 sps:$4 sm:$0xff]  }
  0x58   :  { %v3017_v35 = vld [vmem:[#allocation5 + $0x108] ss:$16 sps:$4 sm:$0xff]   ;;  %v3018_v36 = vld [vmem:[#allocation5 + $0x124] ss:$16 sps:$4 sm:$0xff]   ;;  %v3020_v37 = vld [vmem:[#allocation5 + $0x12c] ss:$16 sps:$4 sm:$0xff]  }
  0x59   :  { %v3022_v38 = vld [vmem:[#allocation5 + $0x120] ss:$16 sps:$4 sm:$0xff]   ;;  %v3023_v39 = vld [vmem:[#allocation5 + $0x128] ss:$16 sps:$4 sm:$0xff]   ;;  %v3024_v40 = vld [vmem:[#allocation5 + $0x144] ss:$16 sps:$4 sm:$0xff]  }
  0x5a   :  { %976 = vmatpush1.bf16.msra.mxu0 %v2986_v14  ;;  %1202 = vmatpush1.bf16.msra.mxu1 %v2987_v15  ;;  %v3026_v41 = vld [vmem:[#allocation5 + $0x14c] ss:$16 sps:$4 sm:$0xff]   ;;  %v3028_v42 = vld [vmem:[#allocation5 + $0x140] ss:$16 sps:$4 sm:$0xff]   ;;  %v3029_v43 = vld [vmem:[#allocation5 + $0x148] ss:$16 sps:$4 sm:$0xff]  }
  0x5b   :  { %977 = vmatprep.subr.bf16.mxu0 %v2988_v16  ;;  %1203 = vmatprep.subr.bf16.mxu1 %v2990_v17  ;;  %v3030_v44 = vld [vmem:[#allocation5 + $0x164] ss:$16 sps:$4 sm:$0xff]   ;;  %v3032_v45 = vld [vmem:[#allocation5 + $0x16c] ss:$16 sps:$4 sm:$0xff]   ;;  %v3034_v47 = vld [vmem:[#allocation5 + $0x160] ss:$16 sps:$4 sm:$0xff]  }
  0x5c   :  { %v84_v46 = vld [vmem:[#allocation2 + $0x8] sm:$0xff]  ;;  %v3036_v50 = vld [vmem:[#allocation5 + $0x184] ss:$16 sps:$4 sm:$0xff]   ;;  %v3040_v53 = vld [vmem:[#allocation5 + $0x180] ss:$16 sps:$4 sm:$0xff]  }
  0x5d   :  { %v3035_v48 = vld [vmem:[#allocation5 + $0x168] ss:$16 sps:$4 sm:$0xff]   ;;  %v3038_v52 = vld [vmem:[#allocation5 + $0x18c] ss:$16 sps:$4 sm:$0xff]   ;;  %v3042_v55 = vld [vmem:[#allocation5 + $0x1a4] ss:$16 sps:$4 sm:$0xff]  }
  0x5e   :  { %978 = vmatpush1.bf16.msra.mxu0 %v2992_v18  ;;  %1204 = vmatpush1.bf16.msra.mxu1 %v2993_v19  ;;  %v88_v49 = vld [vmem:[#allocation2 + $0x28] sm:$0xff]  ;;  %v3046_v57 = vld [vmem:[#allocation5 + $0x1a0] ss:$16 sps:$4 sm:$0xff]   ;;  %v3048_v59 = vld [vmem:[#allocation5 + $0x1c4] ss:$16 sps:$4 sm:$0xff]  }
  0x5f   :  { %979 = vmatprep.subr.bf16.mxu0 %v2994_v20  ;;  %1205 = vmatprep.subr.bf16.mxu1 %v2996_v21  ;;  %v148_v51 = vpack.c.bf16 %v88_v49, %v84_v46  ;;  %v3041_v54 = vld [vmem:[#allocation5 + $0x188] ss:$16 sps:$4 sm:$0xff]   ;;  %v3044_v56 = vld [vmem:[#allocation5 + $0x1ac] ss:$16 sps:$4 sm:$0xff]   ;;  %v3052_v61 = vld [vmem:[#allocation5 + $0x1c0] ss:$16 sps:$4 sm:$0xff]  }
  0x60   :  { %v3047_v58 = vld [vmem:[#allocation5 + $0x1a8] ss:$16 sps:$4 sm:$0xff]   ;;  %v3050_v60 = vld [vmem:[#allocation5 + $0x1cc] ss:$16 sps:$4 sm:$0xff]   ;;  %v3054_v63 = vld [vmem:[#allocation5 + $0x1e4] ss:$16 sps:$4 sm:$0xff]  }
  0x61   :  { %1001 = vmatprep.mubr.bf16.mxu0 %v148_v51  ;;  %1227 = vmatprep.mubr.bf16.mxu1 %v148_v51  ;;  %v3053_v62 = vld [vmem:[#allocation5 + $0x1c8] ss:$16 sps:$4 sm:$0xff]   ;;  %v3056_v0 = vld [vmem:[#allocation5 + $0x1ec] ss:$16 sps:$4 sm:$0xff]   ;;  %v3058_v1 = vld [vmem:[#allocation5 + $0x1e0] ss:$16 sps:$4 sm:$0xff]  }
  0x62   :  { %980 = vmatpush1.bf16.msra.mxu0 %v2998_v22  ;;  %1206 = vmatpush1.bf16.msra.mxu1 %v2999_v23  ;;  %v3059_v2 = vld [vmem:[#allocation5 + $0x1e8] ss:$16 sps:$4 sm:$0xff]   ;;  %v83_v3 = vld [vmem:[#allocation2] sm:$0xff]  ;;  %v3065_v6 = vld [vmem:[#allocation5 + $0x20c] ss:$16 sps:$4 sm:$0xff]  }
  0x63   :  { %981 = vmatprep.subr.bf16.mxu0 %v3000_v24  ;;  %1207 = vmatprep.subr.bf16.mxu1 %v3002_v25  ;;  %v87_v4 = vld [vmem:[#allocation2 + $0x20] sm:$0xff]  ;;  %v3063_v9 = vld [vmem:[#allocation5 + $0x208] ss:$16 sps:$4 sm:$0xff]   ;;  %v3071_v13 = vld [vmem:[#allocation5 + $0x22c] ss:$16 sps:$4 sm:$0xff]  }
  0x64   :  { %v3062_v5 = vld [vmem:[#allocation5 + $0x204] ss:$16 sps:$4 sm:$0xff]   ;;  %v3060_v7 = vld [vmem:[#allocation5 + $0x200] ss:$16 sps:$4 sm:$0xff]   ;;  %v147_v8 = vpack.c.bf16 %v87_v4, %v83_v3  ;;  %v92_v10 = vld [vmem:[#allocation2 + $0x48] sm:$0xff] }
  0x65   :  { %v96_v11 = vld [vmem:[#allocation2 + $0x68] sm:$0xff]  ;;  %v3068_v12 = vld [vmem:[#allocation5 + $0x224] ss:$16 sps:$4 sm:$0xff]   ;;  %v3066_v14 = vld [vmem:[#allocation5 + $0x220] ss:$16 sps:$4 sm:$0xff]  }
  0x66   :  { %982 = vmatpush1.bf16.msra.mxu0 %v3004_v26  ;;  %1208 = vmatpush1.bf16.msra.mxu1 %v3005_v27  ;;  %v152_v15 = vpack.c.bf16 %v96_v11, %v92_v10  ;;  %v3069_v16 = vld [vmem:[#allocation5 + $0x228] ss:$16 sps:$4 sm:$0xff]   ;;  %v91_v17 = vld [vmem:[#allocation2 + $0x40] sm:$0xff]  ;;  %v3077_v20 = vld [vmem:[#allocation5 + $0x24c] ss:$16 sps:$4 sm:$0xff]  }
  0x67   :  { %983 = vmatprep.subr.bf16.mxu0 %v3006_v28  ;;  %1209 = vmatprep.subr.bf16.mxu1 %v3008_v29  ;;  %v95_v18 = vld [vmem:[#allocation2 + $0x60] sm:$0xff]  ;;  %v3075_v22 = vld [vmem:[#allocation5 + $0x248] ss:$16 sps:$4 sm:$0xff]   ;;  %v3083_v27 = vld [vmem:[#allocation5 + $0x26c] ss:$16 sps:$4 sm:$0xff]  }
  0x68   :  { %v3074_v19 = vld [vmem:[#allocation5 + $0x244] ss:$16 sps:$4 sm:$0xff]   ;;  %v3072_v21 = vld [vmem:[#allocation5 + $0x240] ss:$16 sps:$4 sm:$0xff]   ;;  %v151_v23 = vpack.c.bf16 %v95_v18, %v91_v17  ;;  %v100_v24 = vld [vmem:[#allocation2 + $0x88] sm:$0xff] }
  0x69   :  { %v104_v25 = vld [vmem:[#allocation2 + $0xa8] sm:$0xff]  ;;  %v3080_v26 = vld [vmem:[#allocation5 + $0x264] ss:$16 sps:$4 sm:$0xff]   ;;  %v3078_v29 = vld [vmem:[#allocation5 + $0x260] ss:$16 sps:$4 sm:$0xff]  }
  0x6a   :  { %984 = vmatpush1.bf16.msra.mxu0 %v3010_v30  ;;  %1210 = vmatpush1.bf16.msra.mxu1 %v3011_v31  ;;  %v156_v28 = vpack.c.bf16 %v104_v25, %v100_v24  ;;  %v3081_v30 = vld [vmem:[#allocation5 + $0x268] ss:$16 sps:$4 sm:$0xff]   ;;  %v99_v31 = vld [vmem:[#allocation2 + $0x80] sm:$0xff] }
  0x6b   :  { %985 = vmatprep.subr.bf16.mxu0 %v3012_v32  ;;  %1211 = vmatprep.subr.bf16.mxu1 %v3014_v33  ;;  %v103_v32 = vld [vmem:[#allocation2 + $0xa0] sm:$0xff]  ;;  %v116_v51 = vld [vmem:[#allocation2 + $0x108] sm:$0xff] }
  0x6c   :  { %v3086_v33 = vld [vmem:[#allocation5 + $0x284] ss:$16 sps:$4 sm:$0xff]   ;;  %v3096_v49 = vld [vmem:[#allocation5 + $0x2c0] ss:$16 sps:$4 sm:$0xff]   ;;  %v3111_v3 = vld [vmem:[#allocation5 + $0x308] ss:$16 sps:$4 sm:$0xff]  }
  0x6d   :  { %v111_v46 = vld [vmem:[#allocation2 + $0xe0] sm:$0xff]  ;;  %v3123_v17 = vld [vmem:[#allocation5 + $0x348] ss:$16 sps:$4 sm:$0xff]  }
  0x6e   :  { %986 = vmatpush1.bf16.msra.mxu0 %v3016_v34  ;;  %1212 = vmatpush1.bf16.msra.mxu1 %v3017_v35  ;;  %v3089_v34 = vld [vmem:[#allocation5 + $0x28c] ss:$16 sps:$4 sm:$0xff]   ;;  %v3084_v35 = vld [vmem:[#allocation5 + $0x280] ss:$16 sps:$4 sm:$0xff]   ;;  %v3116_v4 = vld [vmem:[#allocation5 + $0x324] ss:$16 sps:$4 sm:$0xff]  }
  0x6f   :  { %987 = vmatprep.subr.bf16.mxu0 %v3018_v36  ;;  %1213 = vmatprep.subr.bf16.mxu1 %v3020_v37  ;;  %v3087_v36 = vld [vmem:[#allocation5 + $0x288] ss:$16 sps:$4 sm:$0xff]   ;;  %v155_v37 = vpack.c.bf16 %v103_v32, %v99_v31  ;;  %v127_v10 = vld [vmem:[#allocation2 + $0x160] sm:$0xff] }
  0x70   :  { %v3122_v11 = vld [vmem:[#allocation5 + $0x344] ss:$16 sps:$4 sm:$0xff]   ;;  %v144_v31 = vld [vmem:[#allocation2 + $0x1e8] sm:$0xff] }
  0x71   :  { %v3128_v18 = vld [vmem:[#allocation5 + $0x364] ss:$16 sps:$4 sm:$0xff]  }
  0x72   :  { %988 = vmatpush1.bf16.msra.mxu0 %v3022_v38  ;;  %1214 = vmatpush1.bf16.msra.mxu1 %v3023_v39  ;;  %v108_v38 = vld [vmem:[#allocation2 + $0xc8] sm:$0xff]  ;;  %v135_v24 = vld [vmem:[#allocation2 + $0x1a0] sm:$0xff] }
  0x73   :  { %989 = vmatprep.subr.bf16.mxu0 %v3024_v40  ;;  %1215 = vmatprep.subr.bf16.mxu1 %v3026_v41  ;;  %v112_v39 = vld [vmem:[#allocation2 + $0xe8] sm:$0xff]  ;;  %v3092_v40 = vld [vmem:[#allocation5 + $0x2a4] ss:$16 sps:$4 sm:$0xff]  }
  0x74   :  { %v3095_v41 = vld [vmem:[#allocation5 + $0x2ac] ss:$16 sps:$4 sm:$0xff]   ;;  %v3134_v25 = vld [vmem:[#allocation5 + $0x384] ss:$16 sps:$4 sm:$0xff]  }
  0x75   :  { %v3140_v32 = vld [vmem:[#allocation5 + $0x3a4] ss:$16 sps:$4 sm:$0xff]  }
  0x76   :  { %990 = vmatpush1.bf16.msra.mxu0 %v3028_v42  ;;  %1216 = vmatpush1.bf16.msra.mxu1 %v3029_v43  ;;  %v3090_v42 = vld [vmem:[#allocation5 + $0x2a0] ss:$16 sps:$4 sm:$0xff]   ;;  %v160_v43 = vpack.c.bf16 %v112_v39, %v108_v38  ;;  %v3146_v39 = vld [vmem:[#allocation5 + $0x3c4] ss:$16 sps:$4 sm:$0xff]  }
  0x77   :  { %991 = vmatprep.subr.bf16.mxu0 %v3030_v44  ;;  %1217 = vmatprep.subr.bf16.mxu1 %v3032_v45  ;;  %v3093_v44 = vld [vmem:[#allocation5 + $0x2a8] ss:$16 sps:$4 sm:$0xff]   ;;  %v107_v45 = vld [vmem:[#allocation2 + $0xc0] sm:$0xff] }
  0x78   :  { %v143_v38 = vld [vmem:[#allocation2 + $0x1e0] sm:$0xff] }
  0x7a   :  { %992 = vmatpush1.bf16.msra.mxu0 %v3034_v47  ;;  %1218 = vmatpush1.bf16.msra.mxu1 %v3035_v48  ;;  %v3098_v47 = vld [vmem:[#allocation5 + $0x2c4] ss:$16 sps:$4 sm:$0xff]   ;;  %v3101_v48 = vld [vmem:[#allocation5 + $0x2cc] ss:$16 sps:$4 sm:$0xff]  }
  0x7b   :  { %993 = vmatprep.subr.bf16.mxu0 %v3036_v50  ;;  %1219 = vmatprep.subr.bf16.mxu1 %v3038_v52  ;;  %v159_v50 = vpack.c.bf16 %v111_v46, %v107_v45  ;;  %v120_v52 = vld [vmem:[#allocation2 + $0x128] sm:$0xff]  ;;  %v90_v45 = vld [vmem:[#allocation2 + $0x38] sm:$0xff]  ;;  %v3152_v46 = vld [vmem:[#allocation5 + $0x3e4] ss:$16 sps:$4 sm:$0xff]  }
  0x7e   :  { %994 = vmatpush1.bf16.msra.mxu0 %v3040_v53  ;;  %1220 = vmatpush1.bf16.msra.mxu1 %v3041_v54  ;;  %v3099_v53 = vld [vmem:[#allocation5 + $0x2c8] ss:$16 sps:$4 sm:$0xff]   ;;  %v3104_v54 = vld [vmem:[#allocation5 + $0x2e4] ss:$16 sps:$4 sm:$0xff]  }
  0x7f   :  { %995 = vmatprep.subr.bf16.mxu0 %v3042_v55  ;;  %1221 = vmatprep.subr.bf16.mxu1 %v3044_v56  ;;  %v3107_v55 = vld [vmem:[#allocation5 + $0x2ec] ss:$16 sps:$4 sm:$0xff]   ;;  %v3102_v56 = vld [vmem:[#allocation5 + $0x2e0] ss:$16 sps:$4 sm:$0xff]  }
  0x82   :  { %996 = vmatpush1.bf16.msra.mxu0 %v3046_v57  ;;  %1222 = vmatpush1.bf16.msra.mxu1 %v3047_v58  ;;  %v3105_v57 = vld [vmem:[#allocation5 + $0x2e8] ss:$16 sps:$4 sm:$0xff]   ;;  %v164_v58 = vpack.c.bf16 %v120_v52, %v116_v51  ;;  %v85_v51 = vld [vmem:[#allocation2 + $0x10] sm:$0xff] }
  0x83   :  { %997 = vmatprep.subr.bf16.mxu0 %v3048_v59  ;;  %1223 = vmatprep.subr.bf16.mxu1 %v3050_v60  ;;  %v115_v59 = vld [vmem:[#allocation2 + $0x100] sm:$0xff]  ;;  %v89_v52 = vld [vmem:[#allocation2 + $0x30] sm:$0xff] }
  0x84   :  { %v119_v60 = vld [vmem:[#allocation2 + $0x120] sm:$0xff] }
  0x86   :  { %998 = vmatpush1.bf16.msra.mxu0 %v3052_v61  ;;  %1224 = vmatpush1.bf16.msra.mxu1 %v3053_v62  ;;  %v3110_v61 = vld [vmem:[#allocation5 + $0x304] ss:$16 sps:$4 sm:$0xff]   ;;  %v3113_v62 = vld [vmem:[#allocation5 + $0x30c] ss:$16 sps:$4 sm:$0xff]  }
  0x87   :  { %999 = vmatprep.subr.bf16.mxu0 %v3054_v63  ;;  %1225 = vmatprep.subr.bf16.mxu1 %v3056_v0  ;;  %v163_v63 = vpack.c.bf16 %v119_v60, %v115_v59  ;;  %v124_v0 = vld [vmem:[#allocation2 + $0x148] sm:$0xff] }
  0x88   :  { %v3156_v59 = vld [vmem:[#allocation7] ss:$8 sps:$4 sm:$0xff]  }
  0x89   :  { %v3492_v60 = vld [vmem:[#allocation7 + $0x100] ss:$8 sps:$4 sm:$0xff]  }
  0x8a   :  { %1000 = vmatpush1.bf16.msra.mxu0 %v3058_v1  ;;  %1226 = vmatpush1.bf16.msra.mxu1 %v3059_v2  ;;  %v128_v1 = vld [vmem:[#allocation2 + $0x168] sm:$0xff]  ;;  %v3108_v2 = vld [vmem:[#allocation5 + $0x300] ss:$16 sps:$4 sm:$0xff]  }
  0x8b   :  { %1082 = vmatprep.subr.bf16.mxu0 %v3062_v5  ;;  %1308 = vmatprep.subr.bf16.mxu1 %v3065_v6  ;;  %v3119_v5 = vld [vmem:[#allocation5 + $0x32c] ss:$16 sps:$4 sm:$0xff]   ;;  %v168_v6 = vpack.c.bf16 %v128_v1, %v124_v0 }
  0x8c   :  { %v3495_v0 = vld [vmem:[#allocation7 + $0x114] ss:$8 sps:$4 sm:$0xff]  }
  0x8d   :  { %1002 = vmatmul.mubr.bf16.vlgmr.msra.gmra.mrb[0].mxu0 %v147_v8  ;;  %1228 = vmatmul.mubr.bf16.vlgmr.msra.gmra.mrb[0].mxu1 %v147_v8  ;;  %v3117_v8 = vld [vmem:[#allocation5 + $0x328] ss:$16 sps:$4 sm:$0xff]  }
  0x8e   :  { %1083 = vmatpush1.bf16.msra.mxu0 %v3060_v7  ;;  %1309 = vmatpush1.bf16.msra.mxu1 %v3063_v9  ;;  %v3114_v7 = vld [vmem:[#allocation5 + $0x320] ss:$16 sps:$4 sm:$0xff]   ;;  %v102_v1 = vld [vmem:[#allocation2 + $0x98] sm:$0xff] }
  0x8f   :  { %1084 = vmatprep.subr.bf16.mxu0 %v3068_v12  ;;  %1310 = vmatprep.subr.bf16.mxu1 %v3071_v13  ;;  %v123_v9 = vld [vmem:[#allocation2 + $0x140] sm:$0xff]  ;;  %v3125_v12 = vld [vmem:[#allocation5 + $0x34c] ss:$16 sps:$4 sm:$0xff]  }
  0x90   :  { %1011 = vmatprep.mubr.bf16.mxu0 %v152_v15  ;;  %1237 = vmatprep.mubr.bf16.mxu1 %v152_v15  ;;  %v167_v13 = vpack.c.bf16 %v127_v10, %v123_v9  ;;  %v136_v15 = vld [vmem:[#allocation2 + $0x1a8] sm:$0xff] }
  0x91   :  { %v3503_v9 = vld [vmem:[#allocation7 + $0x120] ss:$8 sps:$4 sm:$0xff]  }
  0x92   :  { %1085 = vmatpush1.bf16.msra.mxu0 %v3066_v14  ;;  %1311 = vmatpush1.bf16.msra.mxu1 %v3069_v16  ;;  %v132_v14 = vld [vmem:[#allocation2 + $0x188] sm:$0xff]  ;;  %v3120_v16 = vld [vmem:[#allocation5 + $0x340] ss:$16 sps:$4 sm:$0xff]  }
  0x93   :  { %1086 = vmatprep.subr.bf16.mxu0 %v3074_v19  ;;  %1312 = vmatprep.subr.bf16.mxu1 %v3077_v20  ;;  %v3131_v19 = vld [vmem:[#allocation5 + $0x36c] ss:$16 sps:$4 sm:$0xff]   ;;  %v3126_v20 = vld [vmem:[#allocation5 + $0x360] ss:$16 sps:$4 sm:$0xff]  }
  0x95   :  { %1012 = vmatmul.mubr.bf16.gmra.mrb[4].mxu0 %v151_v23  ;;  %1238 = vmatmul.mubr.bf16.gmra.mrb[4].mxu1 %v151_v23  ;;  %v131_v23 = vld [vmem:[#allocation2 + $0x180] sm:$0xff] }
  0x96   :  { %1087 = vmatpush1.bf16.msra.mxu0 %v3072_v21  ;;  %1313 = vmatpush1.bf16.msra.mxu1 %v3075_v22  ;;  %v3129_v21 = vld [vmem:[#allocation5 + $0x368] ss:$16 sps:$4 sm:$0xff]   ;;  %v172_v22 = vpack.c.bf16 %v136_v15, %v132_v14  ;;  %v105_v14 = vld [vmem:[#allocation2 + $0xb0] sm:$0xff] }
  0x97   :  { %1088 = vmatprep.subr.bf16.mxu0 %v3080_v26  ;;  %1314 = vmatprep.subr.bf16.mxu1 %v3083_v27  ;;  %v3137_v26 = vld [vmem:[#allocation5 + $0x38c] ss:$16 sps:$4 sm:$0xff]   ;;  %v3132_v27 = vld [vmem:[#allocation5 + $0x380] ss:$16 sps:$4 sm:$0xff]  }
  0x98   :  { %1021 = vmatprep.mubr.bf16.mxu0 %v156_v28  ;;  %1247 = vmatprep.mubr.bf16.mxu1 %v156_v28  ;;  %v3135_v28 = vld [vmem:[#allocation5 + $0x388] ss:$16 sps:$4 sm:$0xff]  }
  0x99   :  { %v110_v15 = vld [vmem:[#allocation2 + $0xd8] sm:$0xff] }
  0x9a   :  { %1089 = vmatpush1.bf16.msra.mxu0 %v3078_v29  ;;  %1315 = vmatpush1.bf16.msra.mxu1 %v3081_v30  ;;  %v171_v29 = vpack.c.bf16 %v135_v24, %v131_v23  ;;  %v140_v30 = vld [vmem:[#allocation2 + $0x1c8] sm:$0xff] }
  0x9b   :  { %1090 = vmatprep.subr.bf16.mxu0 %v3086_v33  ;;  %1316 = vmatprep.subr.bf16.mxu1 %v3089_v34  ;;  %v3143_v33 = vld [vmem:[#allocation5 + $0x3ac] ss:$16 sps:$4 sm:$0xff]   ;;  %v3138_v34 = vld [vmem:[#allocation5 + $0x3a0] ss:$16 sps:$4 sm:$0xff]  }
  0x9c   :  { %v3515_v23 = vld [vmem:[#allocation7 + $0x140] ss:$8 sps:$4 sm:$0xff]  }
  0x9d   :  { %1022 = vmatmul.mubr.bf16.gmra.mrb[8].mxu0 %v155_v37  ;;  %1248 = vmatmul.mubr.bf16.gmra.mrb[8].mxu1 %v155_v37  ;;  %v139_v37 = vld [vmem:[#allocation2 + $0x1c0] sm:$0xff] }
  0x9e   :  { %1091 = vmatpush1.bf16.msra.mxu0 %v3084_v35  ;;  %1317 = vmatpush1.bf16.msra.mxu1 %v3087_v36  ;;  %v3141_v35 = vld [vmem:[#allocation5 + $0x3a8] ss:$16 sps:$4 sm:$0xff]   ;;  %v176_v36 = vpack.c.bf16 %v144_v31, %v140_v30 }
  0x9f   :  { %1092 = vmatprep.subr.bf16.mxu0 %v3092_v40  ;;  %1318 = vmatprep.subr.bf16.mxu1 %v3095_v41  ;;  %v3149_v40 = vld [vmem:[#allocation5 + $0x3cc] ss:$16 sps:$4 sm:$0xff]   ;;  %v3144_v41 = vld [vmem:[#allocation5 + $0x3c0] ss:$16 sps:$4 sm:$0xff]  }
  0xa0   :  { %1031 = vmatprep.mubr.bf16.mxu0 %v160_v43  ;;  %1257 = vmatprep.mubr.bf16.mxu1 %v160_v43  ;;  %v175_v43 = vpack.c.bf16 %v143_v38, %v139_v37  ;;  %v122_v30 = vld [vmem:[#allocation2 + $0x138] sm:$0xff]  ;;  %v117_v38 = vld [vmem:[#allocation2 + $0x110] sm:$0xff] }
  0xa1   :  { %v3171_v31 = vld [vmem:[#allocation7 + $0x50] ss:$8 sps:$4 sm:$0xff]   ;;  %v3179_v37 = vld [vmem:[#allocation7 + $0x74] ss:$8 sps:$4 sm:$0xff]  }
  0xa2   :  { %1093 = vmatpush1.bf16.msra.mxu0 %v3090_v42  ;;  %1319 = vmatpush1.bf16.msra.mxu1 %v3093_v44  ;;  %v3147_v42 = vld [vmem:[#allocation5 + $0x3c8] ss:$16 sps:$4 sm:$0xff]  }
  0xa3   :  { %1094 = vmatprep.subr.bf16.mxu0 %v3098_v47  ;;  %1320 = vmatprep.subr.bf16.mxu1 %v3101_v48  ;;  %v86_v44 = vld [vmem:[#allocation2 + $0x18] sm:$0xff]  ;;  %v3150_v48 = vld [vmem:[#allocation5 + $0x3e0] ss:$16 sps:$4 sm:$0xff]  }
  0xa4   :  { %v3155_v47 = vld [vmem:[#allocation5 + $0x3ec] ss:$16 sps:$4 sm:$0xff]  }
  0xa5   :  { %1032 = vmatmul.mubr.bf16.gmra.mrb[12].mxu0 %v159_v50  ;;  %1258 = vmatmul.mubr.bf16.gmra.mrb[12].mxu1 %v159_v50  ;;  %v150_v50 = vpack.c.bf16 %v90_v45, %v86_v44 }
  0xa6   :  { %1095 = vmatpush1.bf16.msra.mxu0 %v3096_v49  ;;  %1321 = vmatpush1.bf16.msra.mxu1 %v3099_v53  ;;  %v3153_v49 = vld [vmem:[#allocation5 + $0x3e8] ss:$16 sps:$4 sm:$0xff]  }
  0xa7   :  { %1096 = vmatprep.subr.bf16.mxu0 %v3104_v54  ;;  %1322 = vmatprep.subr.bf16.mxu1 %v3107_v55  ;;  %v94_v53 = vld [vmem:[#allocation2 + $0x58] sm:$0xff]  ;;  %v3158_v55 = vld [vmem:[#allocation7 + $0x4] ss:$8 sps:$4 sm:$0xff]  }
  0xa8   :  { %1041 = vmatprep.mubr.bf16.mxu0 %v164_v58  ;;  %1267 = vmatprep.mubr.bf16.mxu1 %v164_v58  ;;  %v98_v54 = vld [vmem:[#allocation2 + $0x78] sm:$0xff] }
  0xa9   :  { %v154_v58 = vpack.c.bf16 %v98_v54, %v94_v53  ;;  %v3194_v53 = vld [vmem:[#allocation7 + $0xa4] ss:$8 sps:$4 sm:$0xff]  }
  0xaa   :  { %1097 = vmatpush1.bf16.msra.mxu0 %v3102_v56  ;;  %1323 = vmatpush1.bf16.msra.mxu1 %v3105_v57  ;;  %v3490_v56 = vld [vmem:[#allocation7 + $0x104] ss:$8 sps:$4 sm:$0xff]   ;;  %v149_v57 = vpack.c.bf16 %v89_v52, %v85_v51  ;;  %v138_v51 = vld [vmem:[#allocation2 + $0x1b8] sm:$0xff] }
  0xab   :  { %1098 = vmatprep.subr.bf16.mxu0 %v3110_v61  ;;  %1324 = vmatprep.subr.bf16.mxu1 %v3113_v62  ;;  %v93_v61 = vld [vmem:[#allocation2 + $0x50] sm:$0xff] }
  0xac   :  { %v97_v62 = vld [vmem:[#allocation2 + $0x70] sm:$0xff] }
  0xad   :  { %1042 = vmatmul.mubr.bf16.gmra.mrb[16].mxu0 %v163_v63  ;;  %1268 = vmatmul.mubr.bf16.gmra.mrb[16].mxu1 %v163_v63  ;;  %v3161_v63 = vld [vmem:[#allocation7 + $0x14] ss:$8 sps:$4 sm:$0xff]   ;;  %v3186_v52 = vld [vmem:[#allocation7 + $0x90] ss:$8 sps:$4 sm:$0xff]  }
  0xae   :  { %1099 = vmatpush1.bf16.msra.mxu0 %v3108_v2  ;;  %1325 = vmatpush1.bf16.msra.mxu1 %v3111_v3  ;;  %v106_v2 = vld [vmem:[#allocation2 + $0xb8] sm:$0xff] }
  0xaf   :  { %1100 = vmatprep.subr.bf16.mxu0 %v3116_v4  ;;  %1326 = vmatprep.subr.bf16.mxu1 %v3119_v5  ;;  %v3159_v3 = vld [vmem:[#allocation7 + $0x10] ss:$8 sps:$4 sm:$0xff]   ;;  %v3164_v4 = vld [vmem:[#allocation7 + $0x24] ss:$8 sps:$4 sm:$0xff]   ;;  %v158_v10 = vpack.c.bf16 %v106_v2, %v102_v1 }
  0xb0   :  { %1051 = vmatprep.mubr.bf16.mxu0 %v168_v6  ;;  %1277 = vmatprep.mubr.bf16.mxu1 %v168_v6  ;;  %v3498_v5 = vld [vmem:[#allocation7 + $0x110] ss:$8 sps:$4 sm:$0xff]   ;;  %v3500_v6 = vld [vmem:[#allocation7 + $0x124] ss:$8 sps:$4 sm:$0xff]  }
  0xb1   :  { %v3198_v1 = vld [vmem:[#allocation7 + $0xb0] ss:$8 sps:$4 sm:$0xff]   ;;  %v3206_v2 = vld [vmem:[#allocation7 + $0xc4] ss:$8 sps:$4 sm:$0xff]  }
  0xb2   :  { %1101 = vmatpush1.bf16.msra.mxu0 %v3114_v7  ;;  %1327 = vmatpush1.bf16.msra.mxu1 %v3117_v8  ;;  %v153_v7 = vpack.c.bf16 %v97_v62, %v93_v61  ;;  %v3162_v8 = vld [vmem:[#allocation7 + $0x20] ss:$8 sps:$4 sm:$0xff]   ;;  %v137_v61 = vld [vmem:[#allocation2 + $0x1b0] sm:$0xff]  ;;  %v142_v62 = vld [vmem:[#allocation2 + $0x1d8] sm:$0xff] }
  0xb3   :  { %1102 = vmatprep.subr.bf16.mxu0 %v3122_v11  ;;  %1328 = vmatprep.subr.bf16.mxu1 %v3125_v12  ;;  %v3167_v11 = vld [vmem:[#allocation7 + $0x34] ss:$8 sps:$4 sm:$0xff]  }
  0xb4   :  { %v3505_v12 = vld [vmem:[#allocation7 + $0x134] ss:$8 sps:$4 sm:$0xff]  }
  0xb5   :  { %1052 = vmatmul.mubr.bf16.gmra.mrb[20].mxu0 %v167_v13  ;;  %1278 = vmatmul.mubr.bf16.gmra.mrb[20].mxu1 %v167_v13  ;;  %v101_v13 = vld [vmem:[#allocation2 + $0x90] sm:$0xff] }
  0xb6   :  { %1103 = vmatpush1.bf16.msra.mxu0 %v3120_v16  ;;  %1329 = vmatpush1.bf16.msra.mxu1 %v3123_v17  ;;  %v114_v16 = vld [vmem:[#allocation2 + $0xf8] sm:$0xff] }
  0xb7   :  { %1104 = vmatprep.subr.bf16.mxu0 %v3128_v18  ;;  %1330 = vmatprep.subr.bf16.mxu1 %v3131_v19  ;;  %v3165_v17 = vld [vmem:[#allocation7 + $0x30] ss:$8 sps:$4 sm:$0xff]   ;;  %v3170_v19 = vld [vmem:[#allocation7 + $0x44] ss:$8 sps:$4 sm:$0xff]   ;;  %v162_v24 = vpack.c.bf16 %v114_v16, %v110_v15 }
  0xb8   :  { %1061 = vmatprep.mubr.bf16.mxu0 %v172_v22  ;;  %1287 = vmatprep.mubr.bf16.mxu1 %v172_v22  ;;  %v3509_v18 = vld [vmem:[#allocation7 + $0x130] ss:$8 sps:$4 sm:$0xff]   ;;  %v3168_v22 = vld [vmem:[#allocation7 + $0x40] ss:$8 sps:$4 sm:$0xff]   ;;  %v3218_v15 = vld [vmem:[#allocation7 + $0xe4] ss:$8 sps:$4 sm:$0xff]  }
  0xb9   :  { %v3526_v16 = vld [vmem:[#allocation7 + $0x164] ss:$8 sps:$4 sm:$0xff]  }
  0xba   :  { %1105 = vmatpush1.bf16.msra.mxu0 %v3126_v20  ;;  %1331 = vmatpush1.bf16.msra.mxu1 %v3129_v21  ;;  %v3511_v20 = vld [vmem:[#allocation7 + $0x144] ss:$8 sps:$4 sm:$0xff]   ;;  %v157_v21 = vpack.c.bf16 %v105_v14, %v101_v13  ;;  %v3210_v13 = vld [vmem:[#allocation7 + $0xd0] ss:$8 sps:$4 sm:$0xff]  }
  0xbb   :  { %1106 = vmatprep.subr.bf16.mxu0 %v3134_v25  ;;  %1332 = vmatprep.subr.bf16.mxu1 %v3137_v26  ;;  %v3173_v25 = vld [vmem:[#allocation7 + $0x54] ss:$8 sps:$4 sm:$0xff]  }
  0xbc   :  { %v3517_v26 = vld [vmem:[#allocation7 + $0x154] ss:$8 sps:$4 sm:$0xff]  }
  0xbd   :  { %1062 = vmatmul.mubr.bf16.gmra.mrb[24].mxu0 %v171_v29  ;;  %1288 = vmatmul.mubr.bf16.gmra.mrb[24].mxu1 %v171_v29  ;;  %v118_v29 = vld [vmem:[#allocation2 + $0x118] sm:$0xff] }
  0xbe   :  { %1107 = vmatpush1.bf16.msra.mxu0 %v3132_v27  ;;  %1333 = vmatpush1.bf16.msra.mxu1 %v3135_v28  ;;  %v109_v27 = vld [vmem:[#allocation2 + $0xd0] sm:$0xff] }
  0xbf   :  { %1108 = vmatprep.subr.bf16.mxu0 %v3140_v32  ;;  %1334 = vmatprep.subr.bf16.mxu1 %v3143_v33  ;;  %v113_v28 = vld [vmem:[#allocation2 + $0xf0] sm:$0xff]  ;;  %v3176_v33 = vld [vmem:[#allocation7 + $0x64] ss:$8 sps:$4 sm:$0xff]  }
  0xc0   :  { %1071 = vmatprep.mubr.bf16.mxu0 %v176_v36  ;;  %1297 = vmatprep.mubr.bf16.mxu1 %v176_v36  ;;  %v3521_v32 = vld [vmem:[#allocation7 + $0x150] ss:$8 sps:$4 sm:$0xff]   ;;  %v3174_v36 = vld [vmem:[#allocation7 + $0x60] ss:$8 sps:$4 sm:$0xff]  }
  0xc2   :  { %1109 = vmatpush1.bf16.msra.mxu0 %v3138_v34  ;;  %1335 = vmatpush1.bf16.msra.mxu1 %v3141_v35  ;;  %v161_v34 = vpack.c.bf16 %v113_v28, %v109_v27  ;;  %v166_v35 = vpack.c.bf16 %v122_v30, %v118_v29  ;;  %v3539_v27 = vld [vmem:[#allocation7 + $0x184] ss:$8 sps:$4 sm:$0xff]   ;;  %v3541_v28 = vld [vmem:[#allocation7 + $0x180] ss:$8 sps:$4 sm:$0xff]   ;;  %v3545_v29 = vld [vmem:[#allocation7 + $0x194] ss:$8 sps:$4 sm:$0xff]  }
  0xc3   :  { %1110 = vmatprep.subr.bf16.mxu0 %v3146_v39  ;;  %1336 = vmatprep.subr.bf16.mxu1 %v3149_v40  ;;  %v121_v39 = vld [vmem:[#allocation2 + $0x130] sm:$0xff]  ;;  %v126_v40 = vld [vmem:[#allocation2 + $0x158] sm:$0xff] }
  0xc4   :  { %v165_v44 = vpack.c.bf16 %v121_v39, %v117_v38  ;;  %v3547_v30 = vld [vmem:[#allocation7 + $0x190] ss:$8 sps:$4 sm:$0xff]   ;;  %v3575_v39 = vld [vmem:[#allocation7 + $0x1e4] ss:$8 sps:$4 sm:$0xff]  }
  0xc5   :  { %1072 = vmatmul.mubr.bf16.gmra.mrb[28].mxu0 %v175_v43  ;;  %1298 = vmatmul.mubr.bf16.gmra.mrb[28].mxu1 %v175_v43  ;;  %v3182_v43 = vld [vmem:[#allocation7 + $0x84] ss:$8 sps:$4 sm:$0xff]   ;;  %v3571_v38 = vld [vmem:[#allocation7 + $0x1d0] ss:$8 sps:$4 sm:$0xff]  }
  0xc6   :  { %1111 = vmatpush1.bf16.msra.mxu0 %v3144_v41  ;;  %1337 = vmatpush1.bf16.msra.mxu1 %v3147_v42  ;;  %v130_v41 = vld [vmem:[#allocation2 + $0x178] sm:$0xff] }
  0xc7   :  { %1112 = vmatprep.subr.bf16.mxu0 %v3152_v46  ;;  %1338 = vmatprep.subr.bf16.mxu1 %v3155_v47  ;;  %v3177_v42 = vld [vmem:[#allocation7 + $0x70] ss:$8 sps:$4 sm:$0xff]   ;;  %v170_v45 = vpack.c.bf16 %v130_v41, %v126_v40  ;;  %v3180_v46 = vld [vmem:[#allocation7 + $0x80] ss:$8 sps:$4 sm:$0xff]   ;;  %v3188_v47 = vld [vmem:[#allocation7 + $0x94] ss:$8 sps:$4 sm:$0xff]  }
  0xc8   :  { %1114 = vmatprep.mubr.bf16.mxu0 %v150_v50  ;;  %1340 = vmatprep.mubr.bf16.mxu1 %v150_v50  ;;  %v134_v50 = vld [vmem:[#allocation2 + $0x198] sm:$0xff]  ;;  %v3577_v40 = vld [vmem:[#allocation7 + $0x1e0] ss:$8 sps:$4 sm:$0xff]  }
  0xc9   :  { %v3581_v41 = vld [vmem:[#allocation7 + $0x1f4] ss:$8 sps:$4 sm:$0xff]  }
  0xca   :  { %1113 = vmatpush1.bf16.msra.mxu0 %v3150_v48  ;;  %1339 = vmatpush1.bf16.msra.mxu1 %v3153_v49  ;;  %v125_v48 = vld [vmem:[#allocation2 + $0x150] sm:$0xff] }
  0xcb   :  { %1913 = vmatprep.subr.bf16.mxu0 %v3158_v55  ;;  %2727 = vmatprep.subr.bf16.mxu1 %v3490_v56  ;;  %v129_v49 = vld [vmem:[#allocation2 + $0x170] sm:$0xff]  ;;  %v174_v55 = vpack.c.bf16 %v138_v51, %v134_v50 }
  0xcc   :  { %v169_v54 = vpack.c.bf16 %v129_v49, %v125_v48 }
  0xcd   :  { %1115 = vmatmul.mubr.bf16.vlgmr.msra.gmra.mrb[0].mxu0 %v149_v57  ;;  %1341 = vmatmul.mubr.bf16.vlgmr.msra.gmra.mrb[0].mxu1 %v149_v57  ;;  %v3192_v57 = vld [vmem:[#allocation7 + $0xa0] ss:$8 sps:$4 sm:$0xff]  }
  0xce   :  { %1124 = vmatprep.mubr.bf16.mxu0 %v154_v58  ;;  %1350 = vmatprep.mubr.bf16.mxu1 %v154_v58  ;;  %v3200_v58 = vld [vmem:[#allocation7 + $0xb4] ss:$8 sps:$4 sm:$0xff]  }
  0xcf   :  { %1914 = vmatpush1.bf16.msra.mxu0 %v3156_v59  ;;  %2743 = vmatpush1.bf16.msra.mxu1 %v3492_v60  ;;  %v133_v59 = vld [vmem:[#allocation2 + $0x190] sm:$0xff] }
  0xd0   :  { %1915 = vmatprep.subr.bf16.mxu0 %v3161_v63  ;;  %2728 = vmatprep.subr.bf16.mxu1 %v3495_v0  ;;  %v146_v63 = vld [vmem:[#allocation2 + $0x1f8] sm:$0xff] }
  0xd3   :  { %1916 = vmatpush1.bf16.msra.mxu0 %v3159_v3  ;;  %2744 = vmatpush1.bf16.msra.mxu1 %v3498_v5  ;;  %v173_v3 = vpack.c.bf16 %v137_v61, %v133_v59 }
  0xd4   :  { %1917 = vmatprep.subr.bf16.mxu0 %v3164_v4  ;;  %2729 = vmatprep.subr.bf16.mxu1 %v3500_v6  ;;  %v178_v4 = vpack.c.bf16 %v146_v63, %v142_v62 }
  0xd5   :  { %1125 = vmatmul.mubr.bf16.gmra.mrb[4].mxu0 %v153_v7  ;;  %1351 = vmatmul.mubr.bf16.gmra.mrb[4].mxu1 %v153_v7  ;;  %v3204_v7 = vld [vmem:[#allocation7 + $0xc0] ss:$8 sps:$4 sm:$0xff]  }
  0xd6   :  { %1134 = vmatprep.mubr.bf16.mxu0 %v158_v10  ;;  %1360 = vmatprep.mubr.bf16.mxu1 %v158_v10  ;;  %v141_v10 = vld [vmem:[#allocation2 + $0x1d0] sm:$0xff] }
  0xd7   :  { %1918 = vmatpush1.bf16.msra.mxu0 %v3162_v8  ;;  %2745 = vmatpush1.bf16.msra.mxu1 %v3503_v9  ;;  %v3212_v8 = vld [vmem:[#allocation7 + $0xd4] ss:$8 sps:$4 sm:$0xff]  }
  0xd8   :  { %1919 = vmatprep.subr.bf16.mxu0 %v3167_v11  ;;  %2730 = vmatprep.subr.bf16.mxu1 %v3505_v12  ;;  %v145_v11 = vld [vmem:[#allocation2 + $0x1f0] sm:$0xff] }
  0xd9   :  { %v177_v14 = vpack.c.bf16 %v145_v11, %v141_v10 }
  0xdb   :  { %1920 = vmatpush1.bf16.msra.mxu0 %v3165_v17  ;;  %2746 = vmatpush1.bf16.msra.mxu1 %v3509_v18  ;;  %v3216_v17 = vld [vmem:[#allocation7 + $0xe0] ss:$8 sps:$4 sm:$0xff]  }
  0xdc   :  { %1921 = vmatprep.subr.bf16.mxu0 %v3170_v19  ;;  %2731 = vmatprep.subr.bf16.mxu1 %v3511_v20  ;;  %v3528_v19 = vld [vmem:[#allocation7 + $0x160] ss:$8 sps:$4 sm:$0xff]  }
  0xdd   :  { %1135 = vmatmul.mubr.bf16.gmra.mrb[8].mxu0 %v157_v21  ;;  %1361 = vmatmul.mubr.bf16.gmra.mrb[8].mxu1 %v157_v21  ;;  %v3224_v21 = vld [vmem:[#allocation7 + $0xf4] ss:$8 sps:$4 sm:$0xff]  }
  0xde   :  { %1144 = vmatprep.mubr.bf16.mxu0 %v162_v24  ;;  %1370 = vmatprep.mubr.bf16.mxu1 %v162_v24  ;;  %v3222_v24 = vld [vmem:[#allocation7 + $0xf0] ss:$8 sps:$4 sm:$0xff]  }
  0xdf   :  { %1922 = vmatpush1.bf16.msra.mxu0 %v3168_v22  ;;  %2747 = vmatpush1.bf16.msra.mxu1 %v3515_v23  ;;  %v3532_v22 = vld [vmem:[#allocation7 + $0x174] ss:$8 sps:$4 sm:$0xff]  }
  0xe0   :  { %1923 = vmatprep.subr.bf16.mxu0 %v3173_v25  ;;  %2732 = vmatprep.subr.bf16.mxu1 %v3517_v26  ;;  %v3534_v25 = vld [vmem:[#allocation7 + $0x170] ss:$8 sps:$4 sm:$0xff]  }
  0xe3   :  { %1924 = vmatpush1.bf16.msra.mxu0 %v3171_v31  ;;  %2748 = vmatpush1.bf16.msra.mxu1 %v3521_v32  ;;  %v3551_v31 = vld [vmem:[#allocation7 + $0x1a4] ss:$8 sps:$4 sm:$0xff]  }
  0xe4   :  { %1925 = vmatprep.subr.bf16.mxu0 %v3176_v33  ;;  %2733 = vmatprep.subr.bf16.mxu1 %v3526_v16  ;;  %v3553_v33 = vld [vmem:[#allocation7 + $0x1a0] ss:$8 sps:$4 sm:$0xff]  }
  0xe5   :  { %1145 = vmatmul.mubr.bf16.gmra.mrb[12].mxu0 %v161_v34  ;;  %1371 = vmatmul.mubr.bf16.gmra.mrb[12].mxu1 %v161_v34  ;;  %v3559_v34 = vld [vmem:[#allocation7 + $0x1b0] ss:$8 sps:$4 sm:$0xff]  }
  0xe6   :  { %1154 = vmatprep.mubr.bf16.mxu0 %v166_v35  ;;  %1380 = vmatprep.mubr.bf16.mxu1 %v166_v35  ;;  %v3563_v35 = vld [vmem:[#allocation7 + $0x1c4] ss:$8 sps:$4 sm:$0xff]  }
  0xe7   :  { %1926 = vmatpush1.bf16.msra.mxu0 %v3174_v36  ;;  %2749 = vmatpush1.bf16.msra.mxu1 %v3528_v19  ;;  %v3565_v36 = vld [vmem:[#allocation7 + $0x1c0] ss:$8 sps:$4 sm:$0xff]  }
  0xe8   :  { %1927 = vmatprep.subr.bf16.mxu0 %v3179_v37  ;;  %2734 = vmatprep.subr.bf16.mxu1 %v3532_v22  ;;  %v3569_v37 = vld [vmem:[#allocation7 + $0x1d4] ss:$8 sps:$4 sm:$0xff]  }
  0xeb   :  { %1928 = vmatpush1.bf16.msra.mxu0 %v3177_v42  ;;  %2750 = vmatpush1.bf16.msra.mxu1 %v3534_v25  ;;  %v3583_v42 = vld [vmem:[#allocation7 + $0x1f0] ss:$8 sps:$4 sm:$0xff]  }
  0xec   :  { %1929 = vmatprep.subr.bf16.mxu0 %v3182_v43  ;;  %2735 = vmatprep.subr.bf16.mxu1 %v3539_v27  ;;  %v309_v43 = vlaneseq }
  0xed   :  { %1155 = vmatmul.mubr.bf16.gmra.mrb[16].mxu0 %v165_v44  ;;  %1381 = vmatmul.mubr.bf16.gmra.mrb[16].mxu1 %v165_v44 }
  0xee   :  { %1164 = vmatprep.mubr.bf16.mxu0 %v170_v45  ;;  %1390 = vmatprep.mubr.bf16.mxu1 %v170_v45  ;;  %v3587_v44 = vshrl.u32 %v309_v43, 7 }
  0xef   :  { %1930 = vmatpush1.bf16.msra.mxu0 %v3180_v46  ;;  %2751 = vmatpush1.bf16.msra.mxu1 %v3541_v28 }
  0xf0   :  { %1931 = vmatprep.subr.bf16.mxu0 %v3188_v47  ;;  %2736 = vmatprep.subr.bf16.mxu1 %v3545_v29  ;;  %v311_v45 = vsub.s32 0, %v3587_v44  ;;  %v319_v46 = vsub.s32 2, %v3587_v44  ;;  %v307_v47 = vld [vmem:[%s3832_s2] sm:$0xf]  ;;  %v315_v48 = vsub.s32 1, %v3587_v44  ;;  %v323_v49 = vsub.s32 3, %v3587_v44 }
  0xf2   :  { %v3598_v50 = vrot.slane %v307_v47, %v311_v45  ;;  %v3600_v51 = vrot.slane %v307_v47, %v319_v46 }
  0xf3   :  { %1932 = vmatpush1.bf16.msra.mxu0 %v3186_v52  ;;  %2752 = vmatpush1.bf16.msra.mxu1 %v3547_v30  ;;  %v3604_v52 = vrot.slane %v307_v47, %v315_v48 }
  0xf4   :  { %1933 = vmatprep.subr.bf16.mxu0 %v3194_v53  ;;  %2737 = vmatprep.subr.bf16.mxu1 %v3551_v31  ;;  %v3606_v53 = vrot.slane %v307_v47, %v323_v49 }
  0xf5   :  { %1165 = vmatmul.mubr.bf16.gmra.mrb[20].mxu0 %v169_v54  ;;  %1391 = vmatmul.mubr.bf16.gmra.mrb[20].mxu1 %v169_v54 }
  0xf6   :  { %1174 = vmatprep.mubr.bf16.mxu0 %v174_v55  ;;  %1400 = vmatprep.mubr.bf16.mxu1 %v174_v55 }
  0xf7   :  { %1934 = vmatpush1.bf16.msra.mxu0 %v3192_v57  ;;  %2753 = vmatpush1.bf16.msra.mxu1 %v3553_v33 }
  0xf8   :  { %1935 = vmatprep.subr.bf16.mxu0 %v3200_v58 }
  0xfb   :  { %1936 = vmatpush1.bf16.msra.mxu0 %v3198_v1 }
  0xfc   :  { %1937 = vmatprep.subr.bf16.mxu0 %v3206_v2 }
  0xfd   :  { %1175 = vmatmul.mubr.bf16.gmra.mrb[24].mxu0 %v173_v3  ;;  %1401 = vmatmul.mubr.bf16.gmra.mrb[24].mxu1 %v173_v3 }
  0xfe   :  { %1184 = vmatprep.mubr.bf16.mxu0 %v178_v4  ;;  %1410 = vmatprep.mubr.bf16.mxu1 %v178_v4 }
  0xff   :  { %1938 = vmatpush1.bf16.msra.mxu0 %v3204_v7 }
 0x100   :  { %1939 = vmatprep.subr.bf16.mxu0 %v3212_v8 }
 0x103   :  { %1940 = vmatpush1.bf16.msra.mxu0 %v3210_v13 }
 0x104   :  { %1941 = vmatprep.subr.bf16.mxu0 %v3218_v15 }
 0x105   :  { %1185 = vmatmul.mubr.bf16.gmra.mrb[28].mxu0 %v177_v14  ;;  %1411 = vmatmul.mubr.bf16.gmra.mrb[28].mxu1 %v177_v14 }
 0x107   :  { %1942 = vmatpush1.bf16.msra.mxu0 %v3216_v17 }
 0x108   :  { %1943 = vmatprep.subr.bf16.mxu0 %v3224_v21 }
 0x10b   :  { %1944 = vmatpush1.bf16.msra.mxu0 %v3222_v24 }
 0x10c   :  { %2026 = vmatprep.subr.bf16.mxu0 %v3490_v56  ;;  %v3557_v56 = vld [vmem:[#allocation7 + $0x1b4] ss:$8 sps:$4 sm:$0xff]  }
 0x10d   :  { %2738 = vmatprep.subr.bf16.mxu1 %v3557_v56 }
 0x10e   :  { %2754 = vmatpush1.bf16.msra.mxu1 %v3559_v34 }
 0x10f   :  { %2739 = vmatprep.subr.bf16.mxu1 %v3563_v35 }
 0x112   :  { %2755 = vmatpush1.bf16.msra.mxu1 %v3565_v36 }
 0x113   :  { %2740 = vmatprep.subr.bf16.mxu1 %v3569_v37 }
 0x116   :  { %2756 = vmatpush1.bf16.msra.mxu1 %v3571_v38 }
 0x117   :  { %2741 = vmatprep.subr.bf16.mxu1 %v3575_v39 }
 0x11a   :  { %2757 = vmatpush1.bf16.msra.mxu1 %v3577_v40 }
 0x11b   :  { %2742 = vmatprep.subr.bf16.mxu1 %v3581_v41 }
 0x11e   :  { %2758 = vmatpush1.bf16.msra.mxu1 %v3583_v42 }
 0x1a0   :  { %v1116_v54 = vpop.f32.mrb[0].mxu0  ;;  %v1342_v55 = vpop.f32.mrb[0].mxu1 }
 0x1a1   :  { %v2759_v57 = vadd.f32 %v1116_v54, %v3598_v50  ;;  %v2791_v58 = vadd.f32 %v1342_v55, %v3600_v51  ;;  %v1118_v59 = vpop.f32.mrb[1].mxu0  ;;  %v1344_v61 = vpop.f32.mrb[1].mxu1 }
 0x1a2   :  { %v2760_v62 = vadd.f32 %v1118_v59, %v3604_v52  ;;  %v2792_v63 = vadd.f32 %v1344_v61, %v3606_v53  ;;  %v1120_v1 = vpop.f32.mrb[2].mxu0  ;;  %v1346_v2 = vpop.f32.mrb[2].mxu1 }
 0x1a3   :  { %v2761_v3 = vadd.f32 %v1120_v1, %v3598_v50  ;;  %v2793_v4 = vadd.f32 %v1346_v2, %v3600_v51  ;;  %v1122_v7 = vpop.f32.mrb[3].mxu0  ;;  %v1348_v8 = vpop.f32.mrb[3].mxu1  ;;  %v1421_v13 = vmax.f32 %v2759_v57, 0.0  ;;  %v1423_v14 = vmax.f32 %v2791_v58, 0.0 }
 0x1a4   :  { %v2762_v10 = vadd.f32 %v1122_v7, %v3604_v52  ;;  %v2794_v11 = vadd.f32 %v1348_v8, %v3606_v53  ;;  %v1422_v21 = vmax.f32 %v2760_v62, 0.0  ;;  %v1424_v24 = vmax.f32 %v2792_v63, 0.0 }
 0x1a5   :  { %v1425_v15 = vmax.f32 %v2761_v3, 0.0  ;;  %v1427_v17 = vmax.f32 %v2793_v4, 0.0 }
 0x1a6   :  { %v1426_v43 = vmax.f32 %v2762_v10, 0.0  ;;  %v1428_v46 = vmax.f32 %v2794_v11, 0.0 }
 0x1a7   :  { %v1485_v47 = vpack.c.bf16 %v1425_v15, %v1421_v13  ;;  %v3616_v49 = vpack.c.bf16 %v1427_v17, %v1423_v14 }
 0x1a8   :  { %v1486_v54 = vpack.c.bf16 %v1426_v43, %v1422_v21  ;;  %v3618_v55 = vpack.c.bf16 %v1428_v46, %v1424_v24  ;;  %v1126_v59 = vpop.f32.mrb[4].mxu0  ;;  %v1352_v61 = vpop.f32.mrb[4].mxu1 }
 0x1a9   :  { %v2763_v1 = vadd.f32 %v1126_v59, %v3598_v50  ;;  %v2795_v2 = vadd.f32 %v1352_v61, %v3600_v51  ;;  %v1128_v57 = vpop.f32.mrb[5].mxu0  ;;  %v1354_v58 = vpop.f32.mrb[5].mxu1 }
 0x1aa   :  { %v2764_v3 = vadd.f32 %v1128_v57, %v3604_v52  ;;  %v2796_v62 = vadd.f32 %v1354_v58, %v3606_v53  ;;  %v1130_v63 = vpop.f32.mrb[6].mxu0  ;;  %v1356_v4 = vpop.f32.mrb[6].mxu1  ;;  %1945 = vmatprep.mubr.bf16.mxu0 %v1486_v54 }
 0x1ab   :  { %v2765_v7 = vadd.f32 %v1130_v63, %v3598_v50  ;;  %v2797_v8 = vadd.f32 %v1356_v4, %v3600_v51  ;;  %v1132_v10 = vpop.f32.mrb[7].mxu0  ;;  %v1358_v11 = vpop.f32.mrb[7].mxu1  ;;  %1946 = vmatmul.mubr.bf16.vlgmr.msra.gmra.mrb[32].mxu0 %v1485_v47  ;;  %v1429_v15 = vmax.f32 %v2763_v1, 0.0  ;;  %v1431_v17 = vmax.f32 %v2795_v2, 0.0 }
 0x1ac   :  { %v2766_v13 = vadd.f32 %v1132_v10, %v3604_v52  ;;  %v2798_v14 = vadd.f32 %v1358_v11, %v3606_v53  ;;  %2027 = vmatpush1.bf16.msra.mxu0 %v3492_v60  ;;  %v1430_v43 = vmax.f32 %v2764_v3, 0.0  ;;  %v1432_v46 = vmax.f32 %v2796_v62, 0.0 }
 0x1ad   :  { %v1433_v21 = vmax.f32 %v2765_v7, 0.0  ;;  %v1435_v24 = vmax.f32 %v2797_v8, 0.0  ;;  %2028 = vmatprep.subr.bf16.mxu0 %v3495_v0 }
 0x1ae   :  { %v1434_v54 = vmax.f32 %v2766_v13, 0.0  ;;  %v1436_v59 = vmax.f32 %v2798_v14, 0.0 }
 0x1af   :  { %v1489_v61 = vpack.c.bf16 %v1433_v21, %v1429_v15  ;;  %v3630_v57 = vpack.c.bf16 %v1435_v24, %v1431_v17 }
 0x1b0   :  { %v1490_v47 = vpack.c.bf16 %v1434_v54, %v1430_v43  ;;  %v3632_v58 = vpack.c.bf16 %v1436_v59, %v1432_v46  ;;  %v1136_v63 = vpop.f32.mrb[8].mxu0  ;;  %v1362_v4 = vpop.f32.mrb[8].mxu1  ;;  %2029 = vmatpush1.bf16.msra.mxu0 %v3498_v5 }
 0x1b1   :  { %v2767_v60 = vadd.f32 %v1136_v63, %v3598_v50  ;;  %v2799_v1 = vadd.f32 %v1362_v4, %v3600_v51  ;;  %v1138_v2 = vpop.f32.mrb[9].mxu0  ;;  %v1364_v0 = vpop.f32.mrb[9].mxu1  ;;  %2030 = vmatprep.subr.bf16.mxu0 %v3500_v6 }
 0x1b2   :  { %v2768_v3 = vadd.f32 %v1138_v2, %v3604_v52  ;;  %v2800_v62 = vadd.f32 %v1364_v0, %v3606_v53  ;;  %v1140_v7 = vpop.f32.mrb[10].mxu0  ;;  %v1366_v8 = vpop.f32.mrb[10].mxu1  ;;  %1955 = vmatprep.mubr.bf16.mxu0 %v1490_v47 }
 0x1b3   :  { %v2769_v10 = vadd.f32 %v1140_v7, %v3598_v50  ;;  %v2801_v11 = vadd.f32 %v1366_v8, %v3600_v51  ;;  %v1142_v5 = vpop.f32.mrb[11].mxu0  ;;  %v1368_v13 = vpop.f32.mrb[11].mxu1  ;;  %1956 = vmatmul.mubr.bf16.gmra.mrb[36].mxu0 %v1489_v61  ;;  %v1437_v6 = vmax.f32 %v2767_v60, 0.0  ;;  %v1439_v17 = vmax.f32 %v2799_v1, 0.0 }
 0x1b4   :  { %v2770_v14 = vadd.f32 %v1142_v5, %v3604_v52  ;;  %v2802_v15 = vadd.f32 %v1368_v13, %v3606_v53  ;;  %2031 = vmatpush1.bf16.msra.mxu0 %v3503_v9  ;;  %v1438_v43 = vmax.f32 %v2768_v3, 0.0  ;;  %v1440_v46 = vmax.f32 %v2800_v62, 0.0 }
 0x1b5   :  { %v1441_v21 = vmax.f32 %v2769_v10, 0.0  ;;  %v1443_v24 = vmax.f32 %v2801_v11, 0.0  ;;  %2032 = vmatprep.subr.bf16.mxu0 %v3505_v12 }
 0x1b6   :  { %v1442_v54 = vmax.f32 %v2770_v14, 0.0  ;;  %v1444_v59 = vmax.f32 %v2802_v15, 0.0 }
 0x1b7   :  { %v1493_v47 = vpack.c.bf16 %v1441_v21, %v1437_v6  ;;  %v3646_v63 = vpack.c.bf16 %v1443_v24, %v1439_v17 }
 0x1b8   :  { %v1494_v61 = vpack.c.bf16 %v1442_v54, %v1438_v43  ;;  %v3648_v4 = vpack.c.bf16 %v1444_v59, %v1440_v46  ;;  %v1146_v2 = vpop.f32.mrb[12].mxu0  ;;  %v1372_v0 = vpop.f32.mrb[12].mxu1  ;;  %2033 = vmatpush1.bf16.msra.mxu0 %v3509_v18 }
 0x1b9   :  { %v2771_v9 = vadd.f32 %v1146_v2, %v3598_v50  ;;  %v2803_v60 = vadd.f32 %v1372_v0, %v3600_v51  ;;  %v1148_v1 = vpop.f32.mrb[13].mxu0  ;;  %v1374_v12 = vpop.f32.mrb[13].mxu1  ;;  %2034 = vmatprep.subr.bf16.mxu0 %v3511_v20 }
 0x1ba   :  { %v2772_v3 = vadd.f32 %v1148_v1, %v3604_v52  ;;  %v2804_v62 = vadd.f32 %v1374_v12, %v3606_v53  ;;  %v1150_v7 = vpop.f32.mrb[14].mxu0  ;;  %v1376_v8 = vpop.f32.mrb[14].mxu1  ;;  %1965 = vmatprep.mubr.bf16.mxu0 %v1494_v61 }
 0x1bb   :  { %v2773_v10 = vadd.f32 %v1150_v7, %v3598_v50  ;;  %v2805_v11 = vadd.f32 %v1376_v8, %v3600_v51  ;;  %v1152_v18 = vpop.f32.mrb[15].mxu0  ;;  %v1378_v5 = vpop.f32.mrb[15].mxu1  ;;  %1966 = vmatmul.mubr.bf16.gmra.mrb[40].mxu0 %v1493_v47  ;;  %v1445_v20 = vmax.f32 %v2771_v9, 0.0  ;;  %v1447_v15 = vmax.f32 %v2803_v60, 0.0 }
 0x1bc   :  { %v2774_v13 = vadd.f32 %v1152_v18, %v3604_v52  ;;  %v2806_v14 = vadd.f32 %v1378_v5, %v3606_v53  ;;  %2035 = vmatpush1.bf16.msra.mxu0 %v3515_v23  ;;  %v1446_v21 = vmax.f32 %v2772_v3, 0.0  ;;  %v1448_v24 = vmax.f32 %v2804_v62, 0.0 }
 0x1bd   :  { %v1449_v6 = vmax.f32 %v2773_v10, 0.0  ;;  %v1451_v17 = vmax.f32 %v2805_v11, 0.0  ;;  %2036 = vmatprep.subr.bf16.mxu0 %v3517_v26 }
 0x1be   :  { %v1450_v43 = vmax.f32 %v2774_v13, 0.0  ;;  %v1452_v46 = vmax.f32 %v2806_v14, 0.0 }
 0x1bf   :  { %v1497_v54 = vpack.c.bf16 %v1449_v6, %v1445_v20  ;;  %v3662_v59 = vpack.c.bf16 %v1451_v17, %v1447_v15 }
 0x1c0   :  { %v1498_v47 = vpack.c.bf16 %v1450_v43, %v1446_v21  ;;  %v3664_v61 = vpack.c.bf16 %v1452_v46, %v1448_v24  ;;  %v1156_v2 = vpop.f32.mrb[16].mxu0  ;;  %v1382_v0 = vpop.f32.mrb[16].mxu1  ;;  %2037 = vmatpush1.bf16.msra.mxu0 %v3521_v32 }
 0x1c1   :  { %v2775_v23 = vadd.f32 %v1156_v2, %v3598_v50  ;;  %v2807_v9 = vadd.f32 %v1382_v0, %v3600_v51  ;;  %v1158_v60 = vpop.f32.mrb[17].mxu0  ;;  %v1384_v26 = vpop.f32.mrb[17].mxu1  ;;  %2038 = vmatprep.subr.bf16.mxu0 %v3526_v16 }
 0x1c2   :  { %v2776_v1 = vadd.f32 %v1158_v60, %v3604_v52  ;;  %v2808_v12 = vadd.f32 %v1384_v26, %v3606_v53  ;;  %v1160_v3 = vpop.f32.mrb[18].mxu0  ;;  %v1386_v62 = vpop.f32.mrb[18].mxu1  ;;  %1975 = vmatprep.mubr.bf16.mxu0 %v1498_v47 }
 0x1c3   :  { %v2777_v7 = vadd.f32 %v1160_v3, %v3598_v50  ;;  %v2809_v8 = vadd.f32 %v1386_v62, %v3600_v51  ;;  %v1162_v32 = vpop.f32.mrb[19].mxu0  ;;  %v1388_v10 = vpop.f32.mrb[19].mxu1  ;;  %1976 = vmatmul.mubr.bf16.gmra.mrb[44].mxu0 %v1497_v54  ;;  %v1453_v16 = vmax.f32 %v2775_v23, 0.0  ;;  %v1455_v5 = vmax.f32 %v2807_v9, 0.0 }
 0x1c4   :  { %v2778_v11 = vadd.f32 %v1162_v32, %v3604_v52  ;;  %v2810_v18 = vadd.f32 %v1388_v10, %v3606_v53  ;;  %2039 = vmatpush1.bf16.msra.mxu0 %v3528_v19  ;;  %v1454_v20 = vmax.f32 %v2776_v1, 0.0  ;;  %v1456_v15 = vmax.f32 %v2808_v12, 0.0 }
 0x1c5   :  { %v1457_v13 = vmax.f32 %v2777_v7, 0.0  ;;  %v1459_v14 = vmax.f32 %v2809_v8, 0.0  ;;  %2040 = vmatprep.subr.bf16.mxu0 %v3532_v22 }
 0x1c6   :  { %v1458_v6 = vmax.f32 %v2778_v11, 0.0  ;;  %v1460_v17 = vmax.f32 %v2810_v18, 0.0 }
 0x1c7   :  { %v1501_v21 = vpack.c.bf16 %v1457_v13, %v1453_v16  ;;  %v1503_v24 = vpack.c.bf16 %v1459_v14, %v1455_v5 }
 0x1c8   :  { %v1502_v43 = vpack.c.bf16 %v1458_v6, %v1454_v20  ;;  %v1504_v46 = vpack.c.bf16 %v1460_v17, %v1456_v15  ;;  %v1166_v54 = vpop.f32.mrb[20].mxu0  ;;  %v1392_v47 = vpop.f32.mrb[20].mxu1  ;;  %2041 = vmatpush1.bf16.msra.mxu0 %v3534_v25 }
 0x1c9   :  { %v2779_v19 = vadd.f32 %v1166_v54, %v3598_v50  ;;  %v2811_v2 = vadd.f32 %v1392_v47, %v3600_v51  ;;  %v1168_v0 = vpop.f32.mrb[21].mxu0  ;;  %v1394_v23 = vpop.f32.mrb[21].mxu1  ;;  %2042 = vmatprep.subr.bf16.mxu0 %v3539_v27 }
 0x1ca   :  { %v2780_v22 = vadd.f32 %v1168_v0, %v3604_v52  ;;  %v2812_v9 = vadd.f32 %v1394_v23, %v3606_v53  ;;  %v1170_v60 = vpop.f32.mrb[22].mxu0  ;;  %v1396_v26 = vpop.f32.mrb[22].mxu1  ;;  %1985 = vmatprep.mubr.bf16.mxu0 %v1502_v43  ;;  %2098 = vmatprep.mubr.bf16.mxu1 %v1504_v46 }
 0x1cb   :  { %v2781_v1 = vadd.f32 %v1170_v60, %v3598_v50  ;;  %v2813_v25 = vadd.f32 %v1396_v26, %v3600_v51  ;;  %v1172_v12 = vpop.f32.mrb[23].mxu0  ;;  %v1398_v3 = vpop.f32.mrb[23].mxu1  ;;  %1986 = vmatmul.mubr.bf16.gmra.mrb[48].mxu0 %v1501_v21  ;;  %2099 = vmatmul.mubr.bf16.vlgmr.msra.gmra.mrb[32].mxu1 %v1503_v24  ;;  %v1461_v7 = vmax.f32 %v2779_v19, 0.0  ;;  %v1463_v8 = vmax.f32 %v2811_v2, 0.0 }
 0x1cc   :  { %v2782_v62 = vadd.f32 %v1172_v12, %v3604_v52  ;;  %v2814_v27 = vadd.f32 %v1398_v3, %v3606_v53  ;;  %2043 = vmatpush1.bf16.msra.mxu0 %v3541_v28  ;;  %v1462_v11 = vmax.f32 %v2780_v22, 0.0  ;;  %v1464_v18 = vmax.f32 %v2812_v9, 0.0 }
 0x1cd   :  { %v1465_v32 = vmax.f32 %v2781_v1, 0.0  ;;  %v1467_v10 = vmax.f32 %v2813_v25, 0.0  ;;  %2044 = vmatprep.subr.bf16.mxu0 %v3545_v29 }
 0x1ce   :  { %v1466_v16 = vmax.f32 %v2782_v62, 0.0  ;;  %v1468_v5 = vmax.f32 %v2814_v27, 0.0 }
 0x1cf   :  { %v1505_v13 = vpack.c.bf16 %v1465_v32, %v1461_v7  ;;  %v1507_v14 = vpack.c.bf16 %v1467_v10, %v1463_v8 }
 0x1d0   :  { %v1506_v20 = vpack.c.bf16 %v1466_v16, %v1462_v11  ;;  %v1508_v15 = vpack.c.bf16 %v1468_v5, %v1464_v18  ;;  %v1176_v6 = vpop.f32.mrb[24].mxu0  ;;  %v1402_v17 = vpop.f32.mrb[24].mxu1  ;;  %2045 = vmatpush1.bf16.msra.mxu0 %v3547_v30 }
 0x1d1   :  { %v2783_v28 = vadd.f32 %v1176_v6, %v3598_v50  ;;  %v2815_v21 = vadd.f32 %v1402_v17, %v3600_v51  ;;  %v1178_v24 = vpop.f32.mrb[25].mxu0  ;;  %v1404_v43 = vpop.f32.mrb[25].mxu1  ;;  %2046 = vmatprep.subr.bf16.mxu0 %v3551_v31 }
 0x1d2   :  { %v2784_v29 = vadd.f32 %v1178_v24, %v3604_v52  ;;  %v2816_v46 = vadd.f32 %v1404_v43, %v3606_v53  ;;  %v1180_v54 = vpop.f32.mrb[26].mxu0  ;;  %v1406_v47 = vpop.f32.mrb[26].mxu1  ;;  %1995 = vmatprep.mubr.bf16.mxu0 %v1506_v20  ;;  %2108 = vmatprep.mubr.bf16.mxu1 %v1508_v15 }
 0x1d3   :  { %v2785_v19 = vadd.f32 %v1180_v54, %v3598_v50  ;;  %v2817_v30 = vadd.f32 %v1406_v47, %v3600_v51  ;;  %v1182_v2 = vpop.f32.mrb[27].mxu0  ;;  %v1408_v0 = vpop.f32.mrb[27].mxu1  ;;  %1996 = vmatmul.mubr.bf16.gmra.mrb[52].mxu0 %v1505_v13  ;;  %2109 = vmatmul.mubr.bf16.gmra.mrb[36].mxu1 %v1507_v14  ;;  %v1469_v22 = vmax.f32 %v2783_v28, 0.0  ;;  %v1471_v9 = vmax.f32 %v2815_v21, 0.0 }
 0x1d4   :  { %v2786_v23 = vadd.f32 %v1182_v2, %v3604_v52  ;;  %v2818_v31 = vadd.f32 %v1408_v0, %v3606_v53  ;;  %2047 = vmatpush1.bf16.msra.mxu0 %v3553_v33  ;;  %v1470_v1 = vmax.f32 %v2784_v29, 0.0  ;;  %v1472_v25 = vmax.f32 %v2816_v46, 0.0 }
 0x1d5   :  { %v1473_v60 = vmax.f32 %v2785_v19, 0.0  ;;  %v1475_v26 = vmax.f32 %v2817_v30, 0.0  ;;  %2048 = vmatprep.subr.bf16.mxu0 %v3557_v56 }
 0x1d6   :  { %v1474_v12 = vmax.f32 %v2786_v23, 0.0  ;;  %v1476_v3 = vmax.f32 %v2818_v31, 0.0 }
 0x1d7   :  { %v1509_v62 = vpack.c.bf16 %v1473_v60, %v1469_v22  ;;  %v1511_v27 = vpack.c.bf16 %v1475_v26, %v1471_v9 }
 0x1d8   :  { %v1510_v7 = vpack.c.bf16 %v1474_v12, %v1470_v1  ;;  %v1512_v8 = vpack.c.bf16 %v1476_v3, %v1472_v25  ;;  %v1186_v32 = vpop.f32.mrb[28].mxu0  ;;  %v1412_v10 = vpop.f32.mrb[28].mxu1  ;;  %2049 = vmatpush1.bf16.msra.mxu0 %v3559_v34 }
 0x1d9   :  { %v2787_v33 = vadd.f32 %v1186_v32, %v3598_v50  ;;  %v2819_v11 = vadd.f32 %v1412_v10, %v3600_v51  ;;  %v1188_v18 = vpop.f32.mrb[29].mxu0  ;;  %v1414_v16 = vpop.f32.mrb[29].mxu1  ;;  %2050 = vmatprep.subr.bf16.mxu0 %v3563_v35 }
 0x1da   :  { %v2788_v56 = vadd.f32 %v1188_v18, %v3604_v52  ;;  %v2820_v5 = vadd.f32 %v1414_v16, %v3606_v53  ;;  %v1190_v13 = vpop.f32.mrb[30].mxu0  ;;  %v1416_v14 = vpop.f32.mrb[30].mxu1  ;;  %2005 = vmatprep.mubr.bf16.mxu0 %v1510_v7  ;;  %2118 = vmatprep.mubr.bf16.mxu1 %v1512_v8 }
 0x1db   :  { %v2789_v20 = vadd.f32 %v1190_v13, %v3598_v50  ;;  %v2821_v34 = vadd.f32 %v1416_v14, %v3600_v51  ;;  %v1192_v15 = vpop.f32.mrb[31].mxu0  ;;  %v1418_v6 = vpop.f32.mrb[31].mxu1  ;;  %2006 = vmatmul.mubr.bf16.gmra.mrb[56].mxu0 %v1509_v62  ;;  %2119 = vmatmul.mubr.bf16.gmra.mrb[40].mxu1 %v1511_v27  ;;  %v1477_v28 = vmax.f32 %v2787_v33, 0.0  ;;  %v1479_v21 = vmax.f32 %v2819_v11, 0.0 }
 0x1dc   :  { %v2790_v17 = vadd.f32 %v1192_v15, %v3604_v52  ;;  %v2822_v35 = vadd.f32 %v1418_v6, %v3606_v53  ;;  %2051 = vmatpush1.bf16.msra.mxu0 %v3565_v36  ;;  %v1478_v29 = vmax.f32 %v2788_v56, 0.0  ;;  %v1480_v50 = vmax.f32 %v2820_v5, 0.0  ;;  %v3252_v36 = vld [vmem:[#allocation8 + $0x40] sm:$0xff]   ;;  %v3259_v52 = vld [vmem:[#allocation8 + $0x18] sm:$0xff]  }
 0x1dd   :  { %v1481_v24 = vmax.f32 %v2789_v20, 0.0  ;;  %v1483_v43 = vmax.f32 %v2821_v34, 0.0  ;;  %2052 = vmatprep.subr.bf16.mxu0 %v3569_v37  ;;  %v3253_v37 = vld [vmem:[#allocation8] sm:$0xff]   ;;  %2663 = vmatprep.subr.bf16.mxu1 %v3252_v36 }
 0x1de   :  { %v1482_v46 = vmax.f32 %v2790_v17, 0.0  ;;  %v1484_v51 = vmax.f32 %v2822_v35, 0.0  ;;  %2664 = vmatpush3.bf16.msra.mxu1 %v3253_v37  ;;  %v3260_v53 = vld [vmem:[#allocation8 + $0x60] sm:$0xff]  }
 0x1df   :  { %v1513_v54 = vpack.c.bf16 %v1481_v24, %v1477_v28  ;;  %v1515_v47 = vpack.c.bf16 %v1483_v43, %v1479_v21 }
 0x1e0   :  { %v1514_v19 = vpack.c.bf16 %v1482_v46, %v1478_v29  ;;  %v1516_v30 = vpack.c.bf16 %v1484_v51, %v1480_v50  ;;  %2053 = vmatpush1.bf16.msra.mxu0 %v3571_v38  ;;  %v3254_v38 = vld [vmem:[#allocation8 + $0x48] sm:$0xff]  }
 0x1e1   :  { %2054 = vmatprep.subr.bf16.mxu0 %v3575_v39  ;;  %v3255_v39 = vld [vmem:[#allocation8 + $0x8] sm:$0xff]   ;;  %2665 = vmatprep.subr.bf16.mxu1 %v3254_v38 }
 0x1e2   :  { %2015 = vmatprep.mubr.bf16.mxu0 %v1514_v19  ;;  %2128 = vmatprep.mubr.bf16.mxu1 %v1516_v30 }
 0x1e3   :  { %2016 = vmatmul.mubr.bf16.gmra.mrb[60].mxu0 %v1513_v54  ;;  %2129 = vmatmul.mubr.bf16.gmra.mrb[44].mxu1 %v1515_v47 }
 0x1e4   :  { %2055 = vmatpush1.bf16.msra.mxu0 %v3577_v40  ;;  %2058 = vmatprep.mubr.bf16.mxu0 %v3618_v55  ;;  %v3256_v40 = vld [vmem:[#allocation8 + $0x50] sm:$0xff]   ;;  %v3262_v55 = vld [vmem:[#allocation8 + $0x68] sm:$0xff]  }
 0x1e5   :  { %2056 = vmatprep.subr.bf16.mxu0 %v3581_v41  ;;  %2666 = vmatpush3.bf16.msra.mxu1 %v3255_v39  ;;  %v3257_v41 = vld [vmem:[#allocation8 + $0x10] sm:$0xff]  }
 0x1e6   :  { %2667 = vmatprep.subr.bf16.mxu1 %v3256_v40 }
 0x1e8   :  { %2057 = vmatpush1.bf16.msra.mxu0 %v3583_v42  ;;  %v3258_v42 = vld [vmem:[#allocation8 + $0x58] sm:$0xff]  }
 0x1e9   :  { %2668 = vmatpush3.bf16.msra.mxu1 %v3257_v41 }
 0x1ea   :  { %2669 = vmatprep.subr.bf16.mxu1 %v3258_v42 }
 0x1eb   :  { %2059 = vmatmul.mubr.bf16.vlgmr.msra.gmra.mrb[32].mxu0 %v3616_v49  ;;  %v3261_v49 = vld [vmem:[#allocation8 + $0x20] sm:$0xff]  }
 0x1ec   :  { %2068 = vmatprep.mubr.bf16.mxu0 %v3632_v58  ;;  %v3264_v58 = vld [vmem:[#allocation8 + $0x70] sm:$0xff]  }
 0x1ed   :  { %2670 = vmatpush3.bf16.msra.mxu1 %v3259_v52 }
 0x1ee   :  { %2671 = vmatprep.subr.bf16.mxu1 %v3260_v53 }
 0x1f1   :  { %2672 = vmatpush3.bf16.msra.mxu1 %v3261_v49 }
 0x1f2   :  { %2673 = vmatprep.subr.bf16.mxu1 %v3262_v55 }
 0x1f3   :  { %2069 = vmatmul.mubr.bf16.gmra.mrb[36].mxu0 %v3630_v57  ;;  %v3263_v57 = vld [vmem:[#allocation8 + $0x28] sm:$0xff]  }
 0x1f4   :  { %2078 = vmatprep.mubr.bf16.mxu0 %v3648_v4  ;;  %v3266_v4 = vld [vmem:[#allocation8 + $0x78] sm:$0xff]  }
 0x1f5   :  { %2674 = vmatpush3.bf16.msra.mxu1 %v3263_v57 }
 0x1f6   :  { %2675 = vmatprep.subr.bf16.mxu1 %v3264_v58 }
 0x1fb   :  { %2079 = vmatmul.mubr.bf16.gmra.mrb[40].mxu0 %v3646_v63  ;;  %v3265_v63 = vld [vmem:[#allocation8 + $0x30] sm:$0xff]  }
 0x1fc   :  { %2088 = vmatprep.mubr.bf16.mxu0 %v3664_v61  ;;  %2676 = vmatpush3.bf16.msra.mxu1 %v3265_v63  ;;  %v1581_v61 = vld [vmem:[%s3834_s4] sm:$0x3] }
 0x1fd   :  { %2677 = vmatprep.subr.bf16.mxu1 %v3266_v4  ;;  %v3732_v2 = vrot.slane %v1581_v61, %v311_v45  ;;  %v3736_v0 = vrot.slane %v1581_v61, %v315_v48 }
 0x203   :  { %2089 = vmatmul.mubr.bf16.gmra.mrb[44].mxu0 %v3662_v59  ;;  %v3267_v59 = vld [vmem:[#allocation8 + $0x38] sm:$0xff]  }
 0x204   :  { %2678 = vmatpush3.bf16.msra.mxu1 %v3267_v59 }
 0x29e   :  { %v1987_v23 = vpop.f32.mrb[48].mxu0  ;;  %v2100_v31 = vpop.f32.mrb[32].mxu1 }
 0x29f   :  { %v1988_v22 = vadd.f32 %v1987_v23, %v3732_v2  ;;  %v1989_v9 = vpop.f32.mrb[49].mxu0  ;;  %v2102_v60 = vpop.f32.mrb[33].mxu1 }
 0x2a0   :  { %v1990_v26 = vadd.f32 %v1989_v9, %v3736_v0  ;;  %v1991_v1 = vpop.f32.mrb[50].mxu0  ;;  %v2104_v25 = vpop.f32.mrb[34].mxu1 }
 0x2a1   :  { %v2101_v12 = vadd.f32 %v2100_v31, %v1988_v22  ;;  %v1992_v3 = vadd.f32 %v1991_v1, %v3732_v2  ;;  %v1993_v62 = vpop.f32.mrb[51].mxu0  ;;  %v2106_v45 = vpop.f32.mrb[35].mxu1 }
 0x2a2   :  { %v2103_v27 = vadd.f32 %v2102_v60, %v1990_v26  ;;  %v1994_v44 = vadd.f32 %v1993_v62, %v3736_v0 }
 0x2a3   :  { %v2105_v48 = vadd.f32 %v2104_v25, %v1992_v3  ;;  %v2155_v8 = vmax.f32 %v2101_v12, 0.0 }
 0x2a4   :  { %v2107_v7 = vadd.f32 %v2106_v45, %v1994_v44  ;;  %v2156_v10 = vmax.f32 %v2103_v27, 0.0 }
 0x2a5   :  { %v2157_v32 = vmax.f32 %v2105_v48, 0.0 }
 0x2a6   :  { %v2158_v33 = vmax.f32 %v2107_v7, 0.0  ;;  %v1997_v11 = vpop.f32.mrb[52].mxu0  ;;  %v2110_v18 = vpop.f32.mrb[36].mxu1 }
 0x2a7   :  { %v3742_v16 = vpack.c.bf16 %v2157_v32, %v2155_v8  ;;  %v1998_v56 = vadd.f32 %v1997_v11, %v3732_v2  ;;  %v1999_v5 = vpop.f32.mrb[53].mxu0  ;;  %v2112_v13 = vpop.f32.mrb[37].mxu1 }
 0x2a8   :  { %v3745_v14 = vpack.c.bf16 %v2158_v33, %v2156_v10  ;;  %v2000_v20 = vadd.f32 %v1999_v5, %v3736_v0  ;;  %v2001_v34 = vpop.f32.mrb[54].mxu0  ;;  %v2114_v15 = vpop.f32.mrb[38].mxu1 }
 0x2a9   :  { %v2111_v6 = vadd.f32 %v2110_v18, %v1998_v56  ;;  %v2002_v17 = vadd.f32 %v2001_v34, %v3732_v2  ;;  %v2003_v35 = vpop.f32.mrb[55].mxu0  ;;  %v2116_v28 = vpop.f32.mrb[39].mxu1 }
 0x2aa   :  { %v2113_v21 = vadd.f32 %v2112_v13, %v2000_v20  ;;  %v2004_v24 = vadd.f32 %v2003_v35, %v3736_v0 }
 0x2ab   :  { %v2115_v43 = vadd.f32 %v2114_v15, %v2002_v17  ;;  %v2159_v50 = vmax.f32 %v2111_v6, 0.0 }
 0x2ac   :  { %v2117_v29 = vadd.f32 %v2116_v28, %v2004_v24  ;;  %v2160_v51 = vmax.f32 %v2113_v21, 0.0 }
 0x2ad   :  { %v2161_v46 = vmax.f32 %v2115_v43, 0.0 }
 0x2ae   :  { %v2162_v54 = vmax.f32 %v2117_v29, 0.0  ;;  %v2007_v47 = vpop.f32.mrb[56].mxu0  ;;  %v2120_v19 = vpop.f32.mrb[40].mxu1 }
 0x2af   :  { %v3750_v30 = vpack.c.bf16 %v2161_v46, %v2159_v50  ;;  %v2008_v36 = vadd.f32 %v2007_v47, %v3732_v2  ;;  %v2009_v37 = vpop.f32.mrb[57].mxu0  ;;  %v2122_v38 = vpop.f32.mrb[41].mxu1 }
 0x2b0   :  { %v3753_v39 = vpack.c.bf16 %v2162_v54, %v2160_v51  ;;  %v2010_v40 = vadd.f32 %v2009_v37, %v3736_v0  ;;  %v2011_v41 = vpop.f32.mrb[58].mxu0  ;;  %v2124_v42 = vpop.f32.mrb[42].mxu1 }
 0x2b1   :  { %v2121_v52 = vadd.f32 %v2120_v19, %v2008_v36  ;;  %v2012_v53 = vadd.f32 %v2011_v41, %v3732_v2  ;;  %v2013_v49 = vpop.f32.mrb[59].mxu0  ;;  %v2126_v55 = vpop.f32.mrb[43].mxu1 }
 0x2b2   :  { %v2123_v57 = vadd.f32 %v2122_v38, %v2010_v40  ;;  %v2014_v58 = vadd.f32 %v2013_v49, %v3736_v0 }
 0x2b3   :  { %v2125_v63 = vadd.f32 %v2124_v42, %v2012_v53  ;;  %v2163_v59 = vmax.f32 %v2121_v52, 0.0 }
 0x2b4   :  { %v2127_v4 = vadd.f32 %v2126_v55, %v2014_v58  ;;  %v2164_v23 = vmax.f32 %v2123_v57, 0.0 }
 0x2b5   :  { %v2165_v61 = vmax.f32 %v2125_v63, 0.0 }
 0x2b6   :  { %v2166_v31 = vmax.f32 %v2127_v4, 0.0  ;;  %v2017_v22 = vpop.f32.mrb[60].mxu0  ;;  %v2130_v9 = vpop.f32.mrb[44].mxu1 }
 0x2b7   :  { %v3758_v60 = vpack.c.bf16 %v2165_v61, %v2163_v59  ;;  %v2018_v26 = vadd.f32 %v2017_v22, %v3732_v2  ;;  %v2019_v1 = vpop.f32.mrb[61].mxu0  ;;  %v2132_v25 = vpop.f32.mrb[45].mxu1 }
 0x2b8   :  { %v3761_v12 = vpack.c.bf16 %v2166_v31, %v2164_v23  ;;  %v2020_v3 = vadd.f32 %v2019_v1, %v3736_v0  ;;  %v2021_v62 = vpop.f32.mrb[62].mxu0  ;;  %v2134_v45 = vpop.f32.mrb[46].mxu1 }
 0x2b9   :  { %v2131_v27 = vadd.f32 %v2130_v9, %v2018_v26  ;;  %v2022_v44 = vadd.f32 %v2021_v62, %v3732_v2  ;;  %v2023_v48 = vpop.f32.mrb[63].mxu0  ;;  %v2136_v7 = vpop.f32.mrb[47].mxu1 }
 0x2ba   :  { %v2133_v8 = vadd.f32 %v2132_v25, %v2020_v3  ;;  %v2024_v32 = vadd.f32 %v2023_v48, %v3736_v0 }
 0x2bb   :  { %v2135_v10 = vadd.f32 %v2134_v45, %v2022_v44  ;;  %v2167_v11 = vmax.f32 %v2131_v27, 0.0 }
 0x2bc   :  { %v2137_v33 = vadd.f32 %v2136_v7, %v2024_v32  ;;  %v2168_v56 = vmax.f32 %v2133_v8, 0.0 }
 0x2bd   :  { %v2169_v18 = vmax.f32 %v2135_v10, 0.0 }
 0x2be   :  { %v2170_v5 = vmax.f32 %v2137_v33, 0.0  ;;  %v2060_v13 = vpop.f32.mrb[32].mxu0 }
 0x2bf   :  { %v3766_v20 = vpack.c.bf16 %v2169_v18, %v2167_v11  ;;  %v2823_v34 = vadd.f32 %v2060_v13, %v3732_v2  ;;  %v2062_v15 = vpop.f32.mrb[33].mxu0 }
 0x2c0   :  { %v3769_v6 = vpack.c.bf16 %v2170_v5, %v2168_v56  ;;  %v2824_v17 = vadd.f32 %v2062_v15, %v3736_v0  ;;  %v2064_v35 = vpop.f32.mrb[34].mxu0 }
 0x2c1   :  { %v2825_v28 = vadd.f32 %v2064_v35, %v3732_v2  ;;  %v2066_v21 = vpop.f32.mrb[35].mxu0  ;;  %v2139_v43 = vmax.f32 %v2823_v34, 0.0 }
 0x2c2   :  { %v2826_v24 = vadd.f32 %v2066_v21, %v3736_v0  ;;  %v2140_v50 = vmax.f32 %v2824_v17, 0.0 }
 0x2c3   :  { %v2141_v29 = vmax.f32 %v2825_v28, 0.0 }
 0x2c4   :  { %v2142_v46 = vmax.f32 %v2826_v24, 0.0 }
 0x2c5   :  { %v2171_v51 = vpack.c.bf16 %v2141_v29, %v2139_v43 }
 0x2c6   :  { %v2172_v54 = vpack.c.bf16 %v2142_v46, %v2140_v50  ;;  %v2070_v47 = vpop.f32.mrb[36].mxu0 }
 0x2c7   :  { %v2827_v19 = vadd.f32 %v2070_v47, %v3732_v2  ;;  %v2072_v36 = vpop.f32.mrb[37].mxu0 }
 0x2c8   :  { %v2828_v37 = vadd.f32 %v2072_v36, %v3736_v0  ;;  %v2074_v38 = vpop.f32.mrb[38].mxu0  ;;  %2354 = vmatprep.mubr.bf16.mxu1 %v2172_v54 }
 0x2c9   :  { %v2829_v40 = vadd.f32 %v2074_v38, %v3732_v2  ;;  %v2076_v41 = vpop.f32.mrb[39].mxu0  ;;  %2355 = vmatmul.mubr.bf16.vlgmr.msra.gmra.mrb[48].mxu1 %v2171_v51  ;;  %v2143_v52 = vmax.f32 %v2827_v19, 0.0 }
 0x2ca   :  { %v2830_v42 = vadd.f32 %v2076_v41, %v3736_v0  ;;  %v2144_v49 = vmax.f32 %v2828_v37, 0.0 }
 0x2cb   :  { %v2145_v53 = vmax.f32 %v2829_v40, 0.0 }
 0x2cc   :  { %v2146_v55 = vmax.f32 %v2830_v42, 0.0 }
 0x2cd   :  { %v2173_v57 = vpack.c.bf16 %v2145_v53, %v2143_v52 }
 0x2ce   :  { %v2174_v58 = vpack.c.bf16 %v2146_v55, %v2144_v49  ;;  %v2080_v63 = vpop.f32.mrb[40].mxu0 }
 0x2cf   :  { %v2831_v4 = vadd.f32 %v2080_v63, %v3732_v2  ;;  %v2082_v59 = vpop.f32.mrb[41].mxu0 }
 0x2d0   :  { %v2832_v61 = vadd.f32 %v2082_v59, %v3736_v0  ;;  %v2084_v23 = vpop.f32.mrb[42].mxu0  ;;  %2362 = vmatprep.mubr.bf16.mxu1 %v2174_v58 }
 0x2d1   :  { %v2833_v31 = vadd.f32 %v2084_v23, %v3732_v2  ;;  %v2086_v22 = vpop.f32.mrb[43].mxu0  ;;  %2363 = vmatmul.mubr.bf16.gmra.mrb[52].mxu1 %v2173_v57  ;;  %v2147_v26 = vmax.f32 %v2831_v4, 0.0 }
 0x2d2   :  { %v2834_v9 = vadd.f32 %v2086_v22, %v3736_v0  ;;  %v2148_v25 = vmax.f32 %v2832_v61, 0.0 }
 0x2d3   :  { %v2149_v1 = vmax.f32 %v2833_v31, 0.0 }
 0x2d4   :  { %v2150_v3 = vmax.f32 %v2834_v9, 0.0 }
 0x2d5   :  { %v2175_v62 = vpack.c.bf16 %v2149_v1, %v2147_v26 }
 0x2d6   :  { %v2176_v45 = vpack.c.bf16 %v2150_v3, %v2148_v25  ;;  %v2090_v27 = vpop.f32.mrb[44].mxu0 }
 0x2d7   :  { %v2835_v44 = vadd.f32 %v2090_v27, %v3732_v2  ;;  %v2092_v48 = vpop.f32.mrb[45].mxu0 }
 0x2d8   :  { %v2836_v7 = vadd.f32 %v2092_v48, %v3736_v0  ;;  %v2094_v8 = vpop.f32.mrb[46].mxu0  ;;  %2370 = vmatprep.mubr.bf16.mxu1 %v2176_v45 }
 0x2d9   :  { %v2837_v32 = vadd.f32 %v2094_v8, %v3732_v2  ;;  %v2096_v10 = vpop.f32.mrb[47].mxu0  ;;  %2371 = vmatmul.mubr.bf16.gmra.mrb[56].mxu1 %v2175_v62  ;;  %v2151_v11 = vmax.f32 %v2835_v44, 0.0 }
 0x2da   :  { %v2838_v33 = vadd.f32 %v2096_v10, %v3736_v0  ;;  %v2152_v56 = vmax.f32 %v2836_v7, 0.0  ;;  %v3797_v0 = vld [vmem:[%s3836_s6] ss:$0 sm:$0xff]  ;;  %s3398_s6 = smov [#allocation10]  }
 0x2db   :  { %v2153_v18 = vmax.f32 %v2837_v32, 0.0  ;;  %s2440_s10 = sshll.u32 %s3398_s6, 4  ;;  %s2441_s10 = int_to_ptr.vmem [resolvable:$true] %s2440_s10 }
 0x2dc   :  { %v2154_v5 = vmax.f32 %v2838_v33, 0.0  ;;  %s3356_s11 = scalar_lea.vmem %s2441_s10, 2048  ;;  %p3361_p5 = scmp.lt.s32.totalorder %s2441_s10, %s2441_s10 }
 0x2dd   :  { %v2177_v13 = vpack.c.bf16 %v2153_v18, %v2151_v11  ;;  %p3357_p4 = scmp.ne.s32.totalorder %s2441_s10, %s3356_s11  ;;  %p3362_p6 = scmp.lt.s32.totalorder %s3356_s11, %s3356_s11 }
 0x2de   :  { %v2178_v34 = vpack.c.bf16 %v2154_v5, %v2152_v56 }
 0x2df   :  { %p3363_p7 = por %p3362_p6, %p3361_p5 }
 0x2e0   :  { %2378 = vmatprep.mubr.bf16.mxu1 %v2178_v34 }
 0x2e1   :  { %2379 = vmatmul.mubr.bf16.gmra.mrb[60].mxu1 %v2177_v13  ;;  %p3364_p8 = pnand %p3363_p7, %p3357_p4 }
 0x2e2   :  { %2386 = vmatprep.mubr.bf16.mxu1 %v3745_v14 }
 0x2e9   :  { %2387 = vmatmul.mubr.bf16.gmra.mrb[64].mxu1 %v3742_v16 }
 0x2ea   :  { %2394 = vmatprep.mubr.bf16.mxu1 %v3753_v39 }
 0x2f1   :  { %2395 = vmatmul.mubr.bf16.gmra.mrb[68].mxu1 %v3750_v30 }
 0x2f2   :  { %2402 = vmatprep.mubr.bf16.mxu1 %v3761_v12 }
 0x2f9   :  { %2403 = vmatmul.mubr.bf16.gmra.mrb[72].mxu1 %v3758_v60 }
 0x2fa   :  { %2410 = vmatprep.mubr.bf16.mxu1 %v3769_v6 }
 0x301   :  { %2411 = vmatmul.mubr.bf16.gmra.mrb[76].mxu1 %v3766_v20 }
 0x39c   :  { %v2679_v2 = vpop.f32.mrb[48].mxu1 }
 0x39d   :  { %v2680_v14 = vpop.f32.mrb[49].mxu1 }
 0x39e   :  { %v2681_v16 = vadd.f32 %v2680_v14, %v2679_v2  ;;  %v2682_v15 = vpop.f32.mrb[50].mxu1 }
 0x39f   :  { %v2683_v39 = vpop.f32.mrb[51].mxu1 }
 0x3a0   :  { %v2357_v30 = vadd.f32 %v2681_v16, %v3797_v0  ;;  %v2684_v17 = vadd.f32 %v2683_v39, %v2682_v15 }
 0x3a2   :  { %2419 = vst [vmem:[#allocation10] sm:$0xff] %v2357_v30  ;;  %v2360_v60 = vadd.f32 %v2684_v17, %v3797_v0 }
 0x3a4   :  { %2420 = vst [vmem:[#allocation10 + $0x8] sm:$0xff] %v2360_v60  ;;  %v2685_v12 = vpop.f32.mrb[52].mxu1 }
 0x3a5   :  { %v2686_v6 = vpop.f32.mrb[53].mxu1 }
 0x3a6   :  { %v2687_v20 = vadd.f32 %v2686_v6, %v2685_v12  ;;  %v2688_v35 = vpop.f32.mrb[54].mxu1 }
 0x3a7   :  { %v2689_v28 = vpop.f32.mrb[55].mxu1 }
 0x3a8   :  { %v2365_v21 = vadd.f32 %v2687_v20, %v3797_v0  ;;  %v2690_v24 = vadd.f32 %v2689_v28, %v2688_v35 }
 0x3aa   :  { %2421 = vst [vmem:[#allocation10 + $0x10] sm:$0xff] %v2365_v21  ;;  %v2368_v43 = vadd.f32 %v2690_v24, %v3797_v0 }
 0x3ac   :  { %2422 = vst [vmem:[#allocation10 + $0x18] sm:$0xff] %v2368_v43  ;;  %v2691_v29 = vpop.f32.mrb[56].mxu1 }
 0x3ad   :  { %v2692_v50 = vpop.f32.mrb[57].mxu1 }
 0x3ae   :  { %v2693_v46 = vadd.f32 %v2692_v50, %v2691_v29  ;;  %v2694_v51 = vpop.f32.mrb[58].mxu1 }
 0x3af   :  { %v2695_v54 = vpop.f32.mrb[59].mxu1 }
 0x3b0   :  { %v2373_v47 = vadd.f32 %v2693_v46, %v3797_v0  ;;  %v2696_v19 = vadd.f32 %v2695_v54, %v2694_v51 }
 0x3b2   :  { %2423 = vst [vmem:[#allocation10 + $0x20] sm:$0xff] %v2373_v47  ;;  %v2376_v36 = vadd.f32 %v2696_v19, %v3797_v0 }
 0x3b4   :  { %2424 = vst [vmem:[#allocation10 + $0x28] sm:$0xff] %v2376_v36  ;;  %v2697_v37 = vpop.f32.mrb[60].mxu1 }
 0x3b5   :  { %v2698_v38 = vpop.f32.mrb[61].mxu1 }
 0x3b6   :  { %v2699_v40 = vadd.f32 %v2698_v38, %v2697_v37  ;;  %v2700_v41 = vpop.f32.mrb[62].mxu1 }
 0x3b7   :  { %v2701_v42 = vpop.f32.mrb[63].mxu1 }
 0x3b8   :  { %v2381_v52 = vadd.f32 %v2699_v40, %v3797_v0  ;;  %v2702_v53 = vadd.f32 %v2701_v42, %v2700_v41 }
 0x3ba   :  { %2425 = vst [vmem:[#allocation10 + $0x30] sm:$0xff] %v2381_v52  ;;  %v2384_v49 = vadd.f32 %v2702_v53, %v3797_v0 }
 0x3bc   :  { %2426 = vst [vmem:[#allocation10 + $0x38] sm:$0xff] %v2384_v49  ;;  %v2703_v55 = vpop.f32.mrb[64].mxu1 }
 0x3bd   :  { %v2704_v57 = vpop.f32.mrb[65].mxu1 }
 0x3be   :  { %v2705_v58 = vadd.f32 %v2704_v57, %v2703_v55  ;;  %v2706_v63 = vpop.f32.mrb[66].mxu1 }
 0x3bf   :  { %v2707_v4 = vpop.f32.mrb[67].mxu1 }
 0x3c0   :  { %v2389_v59 = vadd.f32 %v2705_v58, %v3797_v0  ;;  %v2708_v61 = vadd.f32 %v2707_v4, %v2706_v63 }
 0x3c2   :  { %2427 = vst [vmem:[#allocation10 + $0x40] sm:$0xff] %v2389_v59  ;;  %v2392_v23 = vadd.f32 %v2708_v61, %v3797_v0 }
 0x3c4   :  { %2428 = vst [vmem:[#allocation10 + $0x48] sm:$0xff] %v2392_v23  ;;  %v2709_v31 = vpop.f32.mrb[68].mxu1 }
 0x3c5   :  { %v2710_v22 = vpop.f32.mrb[69].mxu1 }
 0x3c6   :  { %v2711_v9 = vadd.f32 %v2710_v22, %v2709_v31  ;;  %v2712_v26 = vpop.f32.mrb[70].mxu1 }
 0x3c7   :  { %v2713_v1 = vpop.f32.mrb[71].mxu1 }
 0x3c8   :  { %v2397_v25 = vadd.f32 %v2711_v9, %v3797_v0  ;;  %v2714_v3 = vadd.f32 %v2713_v1, %v2712_v26 }
 0x3ca   :  { %2429 = vst [vmem:[#allocation10 + $0x50] sm:$0xff] %v2397_v25  ;;  %v2400_v62 = vadd.f32 %v2714_v3, %v3797_v0 }
 0x3cc   :  { %2430 = vst [vmem:[#allocation10 + $0x58] sm:$0xff] %v2400_v62  ;;  %v2715_v45 = vpop.f32.mrb[72].mxu1 }
 0x3cd   :  { %v2716_v27 = vpop.f32.mrb[73].mxu1 }
 0x3ce   :  { %v2717_v44 = vadd.f32 %v2716_v27, %v2715_v45  ;;  %v2718_v48 = vpop.f32.mrb[74].mxu1 }
 0x3cf   :  { %v2719_v7 = vpop.f32.mrb[75].mxu1 }
 0x3d0   :  { %v2405_v8 = vadd.f32 %v2717_v44, %v3797_v0  ;;  %v2720_v32 = vadd.f32 %v2719_v7, %v2718_v48 }
 0x3d2   :  { %2431 = vst [vmem:[#allocation10 + $0x60] sm:$0xff] %v2405_v8  ;;  %v2408_v10 = vadd.f32 %v2720_v32, %v3797_v0 }
 0x3d4   :  { %2432 = vst [vmem:[#allocation10 + $0x68] sm:$0xff] %v2408_v10  ;;  %v2721_v33 = vpop.f32.mrb[76].mxu1 }
 0x3d5   :  { %v2722_v11 = vpop.f32.mrb[77].mxu1 }
 0x3d6   :  { %v2723_v18 = vadd.f32 %v2722_v11, %v2721_v33  ;;  %v2724_v56 = vpop.f32.mrb[78].mxu1 }
 0x3d7   :  { %v2725_v5 = vpop.f32.mrb[79].mxu1 }
 0x3d8   :  { %v2413_v13 = vadd.f32 %v2723_v18, %v3797_v0  ;;  %v2726_v34 = vadd.f32 %v2725_v5, %v2724_v56 }
 0x3da   :  { %2433 = vst [vmem:[#allocation10 + $0x70] sm:$0xff] %v2413_v13  ;;  %v2416_v2 = vadd.f32 %v2726_v34, %v3797_v0 }
 0x3dc   :  { %2434 = vst [vmem:[#allocation10 + $0x78] sm:$0xff] %v2416_v2 }
 0x3dd   :  { %3367 = shalt.err (!%p3364_p8)
}
 0x3de   :  { %s3368_s14 = scalar_lea.hbm %s3837_s7, 2048 }
 0x3df   :  { %p3369_p9 = scmp.ne.s32.totalorder %s3837_s7, %s3368_s14  ;;  %p3372_p10 = scmp.lt.u32.totalorder %s3368_s14, %s3837_s7 }
 0x3e1   :  { %p3374_p11 = pnand %p3372_p10, %p3369_p9 }
 0x3e3   :  { %3377 = shalt.err (!%p3374_p11)
}
 0x3e4   :  { %2446 = dma.vmem_to_hbm [thread:$0]  %s2441_s10, 2048, %s3837_s7, [#allocation4], %s3393_s0, %s3393_s0, %s3394_s15  }
 0x3e5   :  { %3384 = dma.done.wait [#allocation4], 2048  }
 0x3e6   :  { %3385 = vsyncadd [#allocation4], 4294965248 }
 0x3e7   :  { %2450 = vsyncpa [#allocation3], 1 }
 0x3e8   :  { %2451 = vsyncpa [#allocation6], 1 }
 0x3e9   :  { %2452 = vsyncpa [#allocation9], 1 }
 0x3ea   :  { %2453 = vsyncpa [#allocation4], 1 }

</bundles_post_ra>
